<compile_context>
chip_gen: v7x
topology: tpu7x:2x2x1
jax: 0.10.0
libtpu: 0.0.40
codegen_flags: <defaults>
</compile_context>

<pallas_src>
import functools
import math

import jax
import jax.numpy as jnp
from jax.experimental import pallas as pl
from jax.experimental.pallas import tpu as pltpu


CONFIG = dict(vocab=100, max_pos=64, dim=32, n_heads=4, ffn=64,
              n_layers=2, num_labels=5)
MATMUL_DTYPE = jnp.bfloat16   # MXU operand dtype; accumulation stays f32.
CLS_PAD = 128                 # lane-dense classifier output width.


# ----------------------------- Pallas kernel ------------------------------- #

def _layernorm(h, g, b, eps):
    mean = jnp.mean(h, axis=-1, keepdims=True)
    var = jnp.mean((h - mean) ** 2, axis=-1, keepdims=True)
    return (h - mean) * jax.lax.rsqrt(var + eps) * g + b


def _fused_forward_kernel(we_ref, pe_ref, mask_ref, embln_ref,
                          wts_ref, lps_ref, clsw_ref, clsb_ref,
                          o_ref, ctx_ref,
                          *, B, S, D, F, n_heads, n_layers, eps):
    """Whole forward (embed LN -> transformer blocks -> classifier), fused."""
    BS = B * S
    Dh = D // n_heads

    # ---- embeddings: word-emb + position-emb (broadcast over batch) + LN ----
    pe = pe_ref[...]                                        # (S, D) f32
    pos = jnp.concatenate([pe] * B, axis=0)                 # (BS, D)
    x = we_ref[...] + pos
    x = _layernorm(x, embln_ref[0:1, :], embln_ref[1:2, :], eps)   # (BS, D) f32
    # dropout after embeddings -> identity (eval mode)

    # ---- additive attention bias, built in-kernel from the int mask --------
    # Batch is folded along sublanes, so attention uses one (BS, BS) score
    # matrix per head with a block-diagonal bias: same-batch keys get the
    # usual 0 / -1e9 mask, cross-batch keys get -1e9 (exp underflows to 0).
    neg_keys = (1.0 - mask_ref[...]) * -1e9                 # (1, BS) f32
    shift = int(math.log2(S))                               # S is a power of two
    blk_row = jax.lax.broadcasted_iota(jnp.int32, (BS, 1), 0) >> shift
    blk_col = jax.lax.broadcasted_iota(jnp.int32, (1, BS), 1) >> shift
    attn_bias = jnp.where(blk_row == blk_col, neg_keys, jnp.float32(-1e9))  # (BS,BS)

    # ---- transformer layers (Python-unrolled; weights resident in VMEM) ----
    for l in range(n_layers):
        w_l = wts_ref[l]                                    # (3D+F, max(3D,F)) bf16
        p_l = lps_ref[l]                                    # (8, max(3D,F)) f32
        w_qkv = w_l[0:D, 0:3 * D]                           # fused QKV weight
        w_o = w_l[D:2 * D, 0:D]
        w_f1 = w_l[2 * D:3 * D, 0:F]
        w_f2 = w_l[3 * D:3 * D + F, 0:D]
        qkv_b = p_l[0:1, 0:3 * D]
        o_b = p_l[1:2, 0:D]
        ln1_g, ln1_b = p_l[2:3, 0:D], p_l[3:4, 0:D]
        f1_b = p_l[4:5, 0:F]
        f2_b = p_l[5:6, 0:D]
        ln2_g, ln2_b = p_l[6:7, 0:D], p_l[7:8, 0:D]

        # fused QKV projection over the whole (BS, D) activation slab
        qkv = jnp.dot(x.astype(w_qkv.dtype), w_qkv,
                      preferred_element_type=jnp.float32) + qkv_b   # (BS, 3D)
        q = qkv[:, 0:D]           # 1/sqrt(Dh) already folded into the Q weight
        k = qkv[:, D:2 * D]
        v = qkv[:, 2 * D:3 * D]

        # per-head attention: heads are static lane slices; q @ k^T via
        # dot_general (MXU); per-head contexts written to VMEM scratch at
        # static lane offsets (no concatenate).
        for h in range(n_heads):
            cs = slice(h * Dh, (h + 1) * Dh)
            qh, kh, vh = q[:, cs], k[:, cs], v[:, cs]                # (BS, Dh)
            s = jax.lax.dot_general(qh, kh, (((1,), (1,)), ((), ())),
                                    preferred_element_type=jnp.float32)
            s = s + attn_bias                                        # (BS, BS)
            s_max = jnp.max(s, axis=-1, keepdims=True)
            p = jnp.exp(s - s_max)
            # approx reciprocal (EUP slot); use exact division for strict parity.
            p = p * pl.reciprocal(jnp.sum(p, axis=-1, keepdims=True), approx=True)
            ctx_ref[:, cs] = jnp.dot(p, vh, preferred_element_type=jnp.float32)

        ctx = ctx_ref[...]                                           # (BS, D)

        # attention output projection + residual + LayerNorm
        attn = jnp.dot(ctx.astype(w_o.dtype), w_o,
                       preferred_element_type=jnp.float32) + o_b
        x = _layernorm(attn + x, ln1_g, ln1_b, eps)

        # FFN1 + GELU + FFN2 + residual + LayerNorm
        hdn = jnp.dot(x.astype(w_f1.dtype), w_f1,
                      preferred_element_type=jnp.float32) + f1_b
        # TODO(synk): HF DistilBERT uses exact erf-GELU; tanh approximation here.
        hdn = jax.nn.gelu(hdn, approximate=True)
        ff = jnp.dot(hdn.astype(w_f2.dtype), w_f2,
                     preferred_element_type=jnp.float32) + f2_b
        x = _layernorm(ff + x, ln2_g, ln2_b, eps)

    # ---- classifier head on the CLS tokens (rows b*S); lane-dense store ----
    cls = jnp.concatenate([x[b * S:b * S + 1, :] for b in range(B)], axis=0)  # (B, D)
    y = jnp.dot(cls.astype(clsw_ref.dtype), clsw_ref[...],
                preferred_element_type=jnp.float32) + clsb_ref[...]
    o_ref[...] = y.astype(o_ref.dtype)                               # (B, 128)


# ------------------------- model (wiring / glue) --------------------------- #

def init_params(key, cfg):
    D, F, V, P = cfg["dim"], cfg["ffn"], cfg["vocab"], cfg["max_pos"]
    L, NL, H = cfg["n_layers"], cfg["num_labels"], cfg["n_heads"]
    Dh = D // H
    q_scale = 1.0 / math.sqrt(Dh)
    std = 0.02
    keys = iter(jax.random.split(key, 6 * L + 3))

    def w(k, shape):
        return jax.random.normal(k, shape, jnp.float32) * std

    WROWS, WCOLS = 3 * D + F, max(3 * D, F, D)
    PCOLS = max(3 * D, F, D)

    wts, lps = [], []
    for _ in range(L):
        wq, wk, wv = w(next(keys), (D, D)), w(next(keys), (D, D)), w(next(keys), (D, D))
        # 1/sqrt(Dh) folded into the Q columns (Q bias is zero, so unaffected).
        qkv_w = jnp.concatenate([wq * q_scale, wk, wv], axis=1)      # (D, 3D)
        o_w = w(next(keys), (D, D))
        f1_w = w(next(keys), (D, F))
        f2_w = w(next(keys), (F, D))

        wbuf = jnp.zeros((WROWS, WCOLS), jnp.float32)
        wbuf = wbuf.at[0:D, 0:3 * D].set(qkv_w)
        wbuf = wbuf.at[D:2 * D, 0:D].set(o_w)
        wbuf = wbuf.at[2 * D:3 * D, 0:F].set(f1_w)
        wbuf = wbuf.at[3 * D:3 * D + F, 0:D].set(f2_w)
        wts.append(wbuf.astype(MATMUL_DTYPE))

        # packed f32 params: rows = [qkv_b, o_b, ln1_g, ln1_b, f1_b, f2_b, ln2_g, ln2_b]
        pbuf = jnp.zeros((8, PCOLS), jnp.float32)
        pbuf = pbuf.at[2, 0:D].set(1.0)     # sa LayerNorm gamma
        pbuf = pbuf.at[6, 0:D].set(1.0)     # output LayerNorm gamma
        lps.append(pbuf)

    cls_w = w(next(keys), (D, NL))
    cls_w_pad = (jnp.zeros((D, CLS_PAD), jnp.float32)
                 .at[:, :NL].set(cls_w).astype(MATMUL_DTYPE))

    return dict(
        dim=D, ffn=F, n_heads=H, n_layers=L, num_labels=NL,
        word_emb=w(next(keys), (V, D)),                      # (V, D) f32
        pos_emb=w(next(keys), (P, D)),                       # (P, D) f32
        emb_ln=jnp.concatenate([jnp.ones((1, D), jnp.float32),
                                jnp.zeros((1, D), jnp.float32)], axis=0),
        wts=jnp.stack(wts),                                  # (L, 3D+F, max) bf16
        lps=jnp.stack(lps),                                  # (L, 8, max) f32
        cls_w_pad=cls_w_pad,                                 # (D, 128) bf16
        cls_b_pad=jnp.zeros((1, CLS_PAD), jnp.float32),
    )


def multi_label_classifier_forward(params, input_ids, attention_mask):
    B, S = input_ids.shape
    D, F = params["dim"], params["ffn"]
    H, L, NL = params["n_heads"], params["n_layers"], params["num_labels"]
    assert S & (S - 1) == 0, "kernel builds the batch-block mask with a shift"

    # Data-dependent embedding-table gather stays in XLA; everything else is
    # ONE fused pallas_call with all weights resident in VMEM.
    we = jnp.take(params["word_emb"], input_ids.reshape(-1), axis=0)   # (B*S, D)
    pe = params["pos_emb"][:S]                                         # (S, D)
    mask = attention_mask.reshape(1, B * S).astype(jnp.float32)        # (1, B*S)

    out = pl.pallas_call(
        functools.partial(_fused_forward_kernel, B=B, S=S, D=D, F=F,
                          n_heads=H, n_layers=L, eps=1e-12),
        out_shape=jax.ShapeDtypeStruct((B, CLS_PAD), jnp.float32),
        scratch_shapes=[pltpu.VMEM((B * S, D), jnp.float32)],          # head ctx
    )(we, pe, mask, params["emb_ln"], params["wts"], params["lps"],
      params["cls_w_pad"], params["cls_b_pad"])

    # dropout(0.2) before the classifier -> identity (eval mode)
    return out[:, :NL]                                                 # (B, num_labels)


# ---------------------------------- main ----------------------------------- #

if __name__ == "__main__":
    cfg = CONFIG
    key = jax.random.PRNGKey(0)
    k_param, k_ids = jax.random.split(key)

    params = init_params(k_param, cfg)

    B, S = 2, 8
    input_ids = jax.random.randint(k_ids, (B, S), 0, cfg["vocab"], dtype=jnp.int32)
    attention_mask = jnp.array(
        [[1, 1, 1, 1, 1, 1, 1, 1],
         [1, 1, 1, 1, 1, 0, 0, 0]], dtype=jnp.int32)

    logits = multi_label_classifier_forward(params, input_ids, attention_mask)
    logits = jax.block_until_ready(logits)
    assert logits.shape == (B, cfg["num_labels"])
    assert bool(jnp.all(jnp.isfinite(logits)))
    print("KERNEL_OK")
</pallas_src>

<mosaic_0001>
module attributes {stable_mosaic.version = 11 : i64} {
  func.func @_fused_forward_kernel(%arg0: memref<16x32xf32, #tpu.memory_space<vmem>>, %arg1: memref<8x32xf32, #tpu.memory_space<vmem>>, %arg2: memref<1x16xf32, #tpu.memory_space<vmem>>, %arg3: memref<2x32xf32, #tpu.memory_space<vmem>>, %arg4: memref<2x160x96xbf16, #tpu.memory_space<vmem>>, %arg5: memref<2x8x96xf32, #tpu.memory_space<vmem>>, %arg6: memref<32x128xbf16, #tpu.memory_space<vmem>>, %arg7: memref<1x128xf32, #tpu.memory_space<vmem>>, %arg8: memref<2x128xf32, #tpu.memory_space<vmem>>, %arg9: memref<16x32xf32, #tpu.memory_space<vmem>>) attributes {dimension_semantics = [], scalar_prefetch = 0 : i64, scratch_operands = 1 : i64, tpu.core_type = #tpu.core_type<tc>} {
    %c0 = arith.constant 0 : index
    %c0_0 = arith.constant 0 : index
    %0 = vector.load %arg1[%c0, %c0_0] : memref<8x32xf32, #tpu.memory_space<vmem>>, vector<8x32xf32>
    %1 = tpu.concatenate %0, %0 in 0 : vector<8x32xf32>, vector<8x32xf32> -> vector<16x32xf32>
    %c0_1 = arith.constant 0 : index
    %c0_2 = arith.constant 0 : index
    %2 = vector.load %arg0[%c0_1, %c0_2] : memref<16x32xf32, #tpu.memory_space<vmem>>, vector<16x32xf32>
    %3 = arith.addf %2, %1 : vector<16x32xf32>
    %c0_3 = arith.constant 0 : index
    %c0_4 = arith.constant 0 : index
    %4 = vector.load %arg3[%c0_3, %c0_4] : memref<2x32xf32, #tpu.memory_space<vmem>>, vector<1x32xf32>
    %c1 = arith.constant 1 : index
    %c0_5 = arith.constant 0 : index
    %5 = vector.load %arg3[%c1, %c0_5] : memref<2x32xf32, #tpu.memory_space<vmem>>, vector<1x32xf32>
    %cst = arith.constant dense<0.000000e+00> : vector<16xf32>
    %6 = vector.multi_reduction <add>, %3, %cst [1] : vector<16x32xf32> to vector<16xf32>
    %7 = vector.shape_cast %6 : vector<16xf32> to vector<16x1xf32>
    %cst_6 = arith.constant 3.200000e+01 : f32
    %8 = vector.broadcast %cst_6 : f32 to vector<16x1xf32>
    %9 = arith.divf %7, %8 : vector<16x1xf32>
    %10 = vector.broadcast %9 : vector<16x1xf32> to vector<16x32xf32>
    %11 = arith.subf %3, %10 : vector<16x32xf32>
    %12 = arith.mulf %11, %11 : vector<16x32xf32>
    %cst_7 = arith.constant dense<0.000000e+00> : vector<16xf32>
    %13 = vector.multi_reduction <add>, %12, %cst_7 [1] : vector<16x32xf32> to vector<16xf32>
    %14 = vector.shape_cast %13 : vector<16xf32> to vector<16x1xf32>
    %cst_8 = arith.constant 3.200000e+01 : f32
    %15 = vector.broadcast %cst_8 : f32 to vector<16x1xf32>
    %16 = arith.divf %14, %15 : vector<16x1xf32>
    %17 = vector.broadcast %9 : vector<16x1xf32> to vector<16x32xf32>
    %18 = arith.subf %3, %17 : vector<16x32xf32>
    %cst_9 = arith.constant 9.99999996E-13 : f32
    %19 = vector.broadcast %cst_9 : f32 to vector<16x1xf32>
    %20 = arith.addf %16, %19 : vector<16x1xf32>
    %21 = math.rsqrt %20 : vector<16x1xf32>
    %22 = vector.broadcast %21 : vector<16x1xf32> to vector<16x32xf32>
    %23 = arith.mulf %18, %22 : vector<16x32xf32>
    %24 = vector.broadcast %4 : vector<1x32xf32> to vector<16x32xf32>
    %25 = arith.mulf %23, %24 : vector<16x32xf32>
    %26 = vector.broadcast %5 : vector<1x32xf32> to vector<16x32xf32>
    %27 = arith.addf %25, %26 : vector<16x32xf32>
    %c0_10 = arith.constant 0 : index
    %c0_11 = arith.constant 0 : index
    %28 = vector.load %arg2[%c0_10, %c0_11] : memref<1x16xf32, #tpu.memory_space<vmem>>, vector<1x16xf32>
    %cst_12 = arith.constant 1.000000e+00 : f32
    %29 = vector.broadcast %cst_12 : f32 to vector<1x16xf32>
    %30 = arith.subf %29, %28 : vector<1x16xf32>
    %cst_13 = arith.constant -1.000000e+09 : f32
    %31 = vector.broadcast %cst_13 : f32 to vector<1x16xf32>
    %32 = arith.mulf %30, %31 : vector<1x16xf32>
    %33 = tpu.iota {dimensions = array<i32: 0>} : vector<16x1xi32>
    %c3_i32 = arith.constant 3 : i32
    %34 = vector.broadcast %c3_i32 : i32 to vector<16x1xi32>
    %35 = arith.shrsi %33, %34 : vector<16x1xi32>
    %36 = tpu.iota {dimensions = array<i32: 1>} : vector<1x16xi32>
    %c3_i32_14 = arith.constant 3 : i32
    %37 = vector.broadcast %c3_i32_14 : i32 to vector<1x16xi32>
    %38 = arith.shrsi %36, %37 : vector<1x16xi32>
    %39 = vector.broadcast %35 : vector<16x1xi32> to vector<16x16xi32>
    %40 = vector.broadcast %38 : vector<1x16xi32> to vector<16x16xi32>
    %41 = arith.cmpi eq, %39, %40 : vector<16x16xi32>
    %cst_15 = arith.constant -1.000000e+09 : f32
    %42 = vector.shape_cast %32 : vector<1x16xf32> to vector<1x16xf32>
    %43 = vector.broadcast %42 : vector<1x16xf32> to vector<16x16xf32>
    %44 = vector.broadcast %cst_15 : f32 to vector<16x16xf32>
    %45 = arith.select %41, %43, %44 : vector<16x16xi1>, vector<16x16xf32>
    %c0_16 = arith.constant 0 : index
    %c0_17 = arith.constant 0 : index
    %c0_18 = arith.constant 0 : index
    %46 = vector.load %arg4[%c0_16, %c0_17, %c0_18] : memref<2x160x96xbf16, #tpu.memory_space<vmem>>, vector<1x160x96xbf16>
    %47 = vector.shape_cast %46 : vector<1x160x96xbf16> to vector<160x96xbf16>
    %c0_19 = arith.constant 0 : index
    %c0_20 = arith.constant 0 : index
    %c0_21 = arith.constant 0 : index
    %48 = vector.load %arg5[%c0_19, %c0_20, %c0_21] : memref<2x8x96xf32, #tpu.memory_space<vmem>>, vector<1x8x96xf32>
    %49 = vector.shape_cast %48 : vector<1x8x96xf32> to vector<8x96xf32>
    %50 = vector.extract_strided_slice %47 {offsets = [0, 0], sizes = [32, 96], strides = [1, 1]} : vector<160x96xbf16> to vector<32x96xbf16>
    %51 = vector.extract_strided_slice %47 {offsets = [32, 0], sizes = [32, 32], strides = [1, 1]} : vector<160x96xbf16> to vector<32x32xbf16>
    %52 = vector.extract_strided_slice %47 {offsets = [64, 0], sizes = [32, 64], strides = [1, 1]} : vector<160x96xbf16> to vector<32x64xbf16>
    %53 = vector.extract_strided_slice %47 {offsets = [96, 0], sizes = [64, 32], strides = [1, 1]} : vector<160x96xbf16> to vector<64x32xbf16>
    %54 = vector.extract_strided_slice %49 {offsets = [0, 0], sizes = [1, 96], strides = [1, 1]} : vector<8x96xf32> to vector<1x96xf32>
    %55 = vector.extract_strided_slice %49 {offsets = [1, 0], sizes = [1, 32], strides = [1, 1]} : vector<8x96xf32> to vector<1x32xf32>
    %56 = vector.extract_strided_slice %49 {offsets = [2, 0], sizes = [1, 32], strides = [1, 1]} : vector<8x96xf32> to vector<1x32xf32>
    %57 = vector.extract_strided_slice %49 {offsets = [3, 0], sizes = [1, 32], strides = [1, 1]} : vector<8x96xf32> to vector<1x32xf32>
    %58 = vector.extract_strided_slice %49 {offsets = [4, 0], sizes = [1, 64], strides = [1, 1]} : vector<8x96xf32> to vector<1x64xf32>
    %59 = vector.extract_strided_slice %49 {offsets = [5, 0], sizes = [1, 32], strides = [1, 1]} : vector<8x96xf32> to vector<1x32xf32>
    %60 = vector.extract_strided_slice %49 {offsets = [6, 0], sizes = [1, 32], strides = [1, 1]} : vector<8x96xf32> to vector<1x32xf32>
    %61 = vector.extract_strided_slice %49 {offsets = [7, 0], sizes = [1, 32], strides = [1, 1]} : vector<8x96xf32> to vector<1x32xf32>
    %62 = arith.truncf %27 : vector<16x32xf32> to vector<16x32xbf16>
    %cst_22 = arith.constant dense<0.000000e+00> : vector<16x96xf32>
    %63 = tpu.matmul %62, %50, %cst_22 {dimension_numbers = #tpu.dot_dimension_numbers<[1], [0], [0], [1], [0, 0, 1, 1], [], []>} : vector<16x32xbf16>, vector<32x96xbf16>, vector<16x96xf32> -> vector<16x96xf32>
    %64 = vector.broadcast %54 : vector<1x96xf32> to vector<16x96xf32>
    %65 = arith.addf %63, %64 : vector<16x96xf32>
    %66 = vector.extract_strided_slice %65 {offsets = [0, 0], sizes = [16, 32], strides = [1, 1]} : vector<16x96xf32> to vector<16x32xf32>
    %67 = vector.extract_strided_slice %65 {offsets = [0, 32], sizes = [16, 32], strides = [1, 1]} : vector<16x96xf32> to vector<16x32xf32>
    %68 = vector.extract_strided_slice %65 {offsets = [0, 64], sizes = [16, 32], strides = [1, 1]} : vector<16x96xf32> to vector<16x32xf32>
    %69 = vector.extract_strided_slice %66 {offsets = [0, 0], sizes = [16, 8], strides = [1, 1]} : vector<16x32xf32> to vector<16x8xf32>
    %70 = vector.extract_strided_slice %67 {offsets = [0, 0], sizes = [16, 8], strides = [1, 1]} : vector<16x32xf32> to vector<16x8xf32>
    %71 = vector.extract_strided_slice %68 {offsets = [0, 0], sizes = [16, 8], strides = [1, 1]} : vector<16x32xf32> to vector<16x8xf32>
    %cst_23 = arith.constant dense<0.000000e+00> : vector<16x16xf32>
    %72 = tpu.matmul %69, %70, %cst_23 {dimension_numbers = #tpu.dot_dimension_numbers<[1], [1], [0], [0], [0, 0, 1, 0], [], []>} : vector<16x8xf32>, vector<16x8xf32>, vector<16x16xf32> -> vector<16x16xf32>
    %73 = arith.addf %72, %45 : vector<16x16xf32>
    %cst_24 = arith.constant dense<0xFF800000> : vector<16xf32>
    %74 = vector.multi_reduction <maximumf>, %73, %cst_24 [1] : vector<16x16xf32> to vector<16xf32>
    %75 = vector.shape_cast %74 : vector<16xf32> to vector<16x1xf32>
    %76 = vector.broadcast %75 : vector<16x1xf32> to vector<16x16xf32>
    %77 = arith.subf %73, %76 : vector<16x16xf32>
    %78 = math.exp %77 : vector<16x16xf32>
    %cst_25 = arith.constant dense<0.000000e+00> : vector<16xf32>
    %79 = vector.multi_reduction <add>, %78, %cst_25 [1] : vector<16x16xf32> to vector<16xf32>
    %80 = vector.shape_cast %79 : vector<16xf32> to vector<16x1xf32>
    %81 = tpu.reciprocal %80 {approx = true} : vector<16x1xf32> -> vector<16x1xf32>
    %82 = vector.broadcast %81 : vector<16x1xf32> to vector<16x16xf32>
    %83 = arith.mulf %78, %82 : vector<16x16xf32>
    %cst_26 = arith.constant dense<0.000000e+00> : vector<16x8xf32>
    %84 = tpu.matmul %83, %71, %cst_26 {dimension_numbers = #tpu.dot_dimension_numbers<[1], [0], [0], [1], [0, 0, 1, 1], [], []>} : vector<16x16xf32>, vector<16x8xf32>, vector<16x8xf32> -> vector<16x8xf32>
    %c0_27 = arith.constant 0 : index
    %c0_28 = arith.constant 0 : index
    %85 = vector.load %arg9[%c0_27, %c0_28] : memref<16x32xf32, #tpu.memory_space<vmem>>, vector<16x8xf32>
    tpu.vector_store %arg9[%c0_27, %c0_28], %84 {strides = array<i32>} : memref<16x32xf32, #tpu.memory_space<vmem>>, vector<16x8xf32>,
    %86 = vector.extract_strided_slice %66 {offsets = [0, 8], sizes = [16, 8], strides = [1, 1]} : vector<16x32xf32> to vector<16x8xf32>
    %87 = vector.extract_strided_slice %67 {offsets = [0, 8], sizes = [16, 8], strides = [1, 1]} : vector<16x32xf32> to vector<16x8xf32>
    %88 = vector.extract_strided_slice %68 {offsets = [0, 8], sizes = [16, 8], strides = [1, 1]} : vector<16x32xf32> to vector<16x8xf32>
    %cst_29 = arith.constant dense<0.000000e+00> : vector<16x16xf32>
    %89 = tpu.matmul %86, %87, %cst_29 {dimension_numbers = #tpu.dot_dimension_numbers<[1], [1], [0], [0], [0, 0, 1, 0], [], []>} : vector<16x8xf32>, vector<16x8xf32>, vector<16x16xf32> -> vector<16x16xf32>
    %90 = arith.addf %89, %45 : vector<16x16xf32>
    %cst_30 = arith.constant dense<0xFF800000> : vector<16xf32>
    %91 = vector.multi_reduction <maximumf>, %90, %cst_30 [1] : vector<16x16xf32> to vector<16xf32>
    %92 = vector.shape_cast %91 : vector<16xf32> to vector<16x1xf32>
    %93 = vector.broadcast %92 : vector<16x1xf32> to vector<16x16xf32>
    %94 = arith.subf %90, %93 : vector<16x16xf32>
    %95 = math.exp %94 : vector<16x16xf32>
    %cst_31 = arith.constant dense<0.000000e+00> : vector<16xf32>
    %96 = vector.multi_reduction <add>, %95, %cst_31 [1] : vector<16x16xf32> to vector<16xf32>
    %97 = vector.shape_cast %96 : vector<16xf32> to vector<16x1xf32>
    %98 = tpu.reciprocal %97 {approx = true} : vector<16x1xf32> -> vector<16x1xf32>
    %99 = vector.broadcast %98 : vector<16x1xf32> to vector<16x16xf32>
    %100 = arith.mulf %95, %99 : vector<16x16xf32>
    %cst_32 = arith.constant dense<0.000000e+00> : vector<16x8xf32>
    %101 = tpu.matmul %100, %88, %cst_32 {dimension_numbers = #tpu.dot_dimension_numbers<[1], [0], [0], [1], [0, 0, 1, 1], [], []>} : vector<16x16xf32>, vector<16x8xf32>, vector<16x8xf32> -> vector<16x8xf32>
    %c0_33 = arith.constant 0 : index
    %c8 = arith.constant 8 : index
    %102 = vector.load %arg9[%c0_33, %c8] : memref<16x32xf32, #tpu.memory_space<vmem>>, vector<16x8xf32>
    tpu.vector_store %arg9[%c0_33, %c8], %101 {strides = array<i32>} : memref<16x32xf32, #tpu.memory_space<vmem>>, vector<16x8xf32>,
    %103 = vector.extract_strided_slice %66 {offsets = [0, 16], sizes = [16, 8], strides = [1, 1]} : vector<16x32xf32> to vector<16x8xf32>
    %104 = vector.extract_strided_slice %67 {offsets = [0, 16], sizes = [16, 8], strides = [1, 1]} : vector<16x32xf32> to vector<16x8xf32>
    %105 = vector.extract_strided_slice %68 {offsets = [0, 16], sizes = [16, 8], strides = [1, 1]} : vector<16x32xf32> to vector<16x8xf32>
    %cst_34 = arith.constant dense<0.000000e+00> : vector<16x16xf32>
    %106 = tpu.matmul %103, %104, %cst_34 {dimension_numbers = #tpu.dot_dimension_numbers<[1], [1], [0], [0], [0, 0, 1, 0], [], []>} : vector<16x8xf32>, vector<16x8xf32>, vector<16x16xf32> -> vector<16x16xf32>
    %107 = arith.addf %106, %45 : vector<16x16xf32>
    %cst_35 = arith.constant dense<0xFF800000> : vector<16xf32>
    %108 = vector.multi_reduction <maximumf>, %107, %cst_35 [1] : vector<16x16xf32> to vector<16xf32>
    %109 = vector.shape_cast %108 : vector<16xf32> to vector<16x1xf32>
    %110 = vector.broadcast %109 : vector<16x1xf32> to vector<16x16xf32>
    %111 = arith.subf %107, %110 : vector<16x16xf32>
    %112 = math.exp %111 : vector<16x16xf32>
    %cst_36 = arith.constant dense<0.000000e+00> : vector<16xf32>
    %113 = vector.multi_reduction <add>, %112, %cst_36 [1] : vector<16x16xf32> to vector<16xf32>
    %114 = vector.shape_cast %113 : vector<16xf32> to vector<16x1xf32>
    %115 = tpu.reciprocal %114 {approx = true} : vector<16x1xf32> -> vector<16x1xf32>
    %116 = vector.broadcast %115 : vector<16x1xf32> to vector<16x16xf32>
    %117 = arith.mulf %112, %116 : vector<16x16xf32>
    %cst_37 = arith.constant dense<0.000000e+00> : vector<16x8xf32>
    %118 = tpu.matmul %117, %105, %cst_37 {dimension_numbers = #tpu.dot_dimension_numbers<[1], [0], [0], [1], [0, 0, 1, 1], [], []>} : vector<16x16xf32>, vector<16x8xf32>, vector<16x8xf32> -> vector<16x8xf32>
    %c0_38 = arith.constant 0 : index
    %c16 = arith.constant 16 : index
    %119 = vector.load %arg9[%c0_38, %c16] : memref<16x32xf32, #tpu.memory_space<vmem>>, vector<16x8xf32>
    tpu.vector_store %arg9[%c0_38, %c16], %118 {strides = array<i32>} : memref<16x32xf32, #tpu.memory_space<vmem>>, vector<16x8xf32>,
    %120 = vector.extract_strided_slice %66 {offsets = [0, 24], sizes = [16, 8], strides = [1, 1]} : vector<16x32xf32> to vector<16x8xf32>
    %121 = vector.extract_strided_slice %67 {offsets = [0, 24], sizes = [16, 8], strides = [1, 1]} : vector<16x32xf32> to vector<16x8xf32>
    %122 = vector.extract_strided_slice %68 {offsets = [0, 24], sizes = [16, 8], strides = [1, 1]} : vector<16x32xf32> to vector<16x8xf32>
    %cst_39 = arith.constant dense<0.000000e+00> : vector<16x16xf32>
    %123 = tpu.matmul %120, %121, %cst_39 {dimension_numbers = #tpu.dot_dimension_numbers<[1], [1], [0], [0], [0, 0, 1, 0], [], []>} : vector<16x8xf32>, vector<16x8xf32>, vector<16x16xf32> -> vector<16x16xf32>
    %124 = arith.addf %123, %45 : vector<16x16xf32>
    %cst_40 = arith.constant dense<0xFF800000> : vector<16xf32>
    %125 = vector.multi_reduction <maximumf>, %124, %cst_40 [1] : vector<16x16xf32> to vector<16xf32>
    %126 = vector.shape_cast %125 : vector<16xf32> to vector<16x1xf32>
    %127 = vector.broadcast %126 : vector<16x1xf32> to vector<16x16xf32>
    %128 = arith.subf %124, %127 : vector<16x16xf32>
    %129 = math.exp %128 : vector<16x16xf32>
    %cst_41 = arith.constant dense<0.000000e+00> : vector<16xf32>
    %130 = vector.multi_reduction <add>, %129, %cst_41 [1] : vector<16x16xf32> to vector<16xf32>
    %131 = vector.shape_cast %130 : vector<16xf32> to vector<16x1xf32>
    %132 = tpu.reciprocal %131 {approx = true} : vector<16x1xf32> -> vector<16x1xf32>
    %133 = vector.broadcast %132 : vector<16x1xf32> to vector<16x16xf32>
    %134 = arith.mulf %129, %133 : vector<16x16xf32>
    %cst_42 = arith.constant dense<0.000000e+00> : vector<16x8xf32>
    %135 = tpu.matmul %134, %122, %cst_42 {dimension_numbers = #tpu.dot_dimension_numbers<[1], [0], [0], [1], [0, 0, 1, 1], [], []>} : vector<16x16xf32>, vector<16x8xf32>, vector<16x8xf32> -> vector<16x8xf32>
    %c0_43 = arith.constant 0 : index
    %c24 = arith.constant 24 : index
    %136 = vector.load %arg9[%c0_43, %c24] : memref<16x32xf32, #tpu.memory_space<vmem>>, vector<16x8xf32>
    tpu.vector_store %arg9[%c0_43, %c24], %135 {strides = array<i32>} : memref<16x32xf32, #tpu.memory_space<vmem>>, vector<16x8xf32>,
    %c0_44 = arith.constant 0 : index
    %c0_45 = arith.constant 0 : index
    %137 = vector.load %arg9[%c0_44, %c0_45] : memref<16x32xf32, #tpu.memory_space<vmem>>, vector<16x32xf32>
    %138 = arith.truncf %137 : vector<16x32xf32> to vector<16x32xbf16>
    %cst_46 = arith.constant dense<0.000000e+00> : vector<16x32xf32>
    %139 = tpu.matmul %138, %51, %cst_46 {dimension_numbers = #tpu.dot_dimension_numbers<[1], [0], [0], [1], [0, 0, 1, 1], [], []>} : vector<16x32xbf16>, vector<32x32xbf16>, vector<16x32xf32> -> vector<16x32xf32>
    %140 = vector.broadcast %55 : vector<1x32xf32> to vector<16x32xf32>
    %141 = arith.addf %139, %140 : vector<16x32xf32>
    %142 = arith.addf %141, %27 : vector<16x32xf32>
    %cst_47 = arith.constant dense<0.000000e+00> : vector<16xf32>
    %143 = vector.multi_reduction <add>, %142, %cst_47 [1] : vector<16x32xf32> to vector<16xf32>
    %144 = vector.shape_cast %143 : vector<16xf32> to vector<16x1xf32>
    %cst_48 = arith.constant 3.200000e+01 : f32
    %145 = vector.broadcast %cst_48 : f32 to vector<16x1xf32>
    %146 = arith.divf %144, %145 : vector<16x1xf32>
    %147 = vector.broadcast %146 : vector<16x1xf32> to vector<16x32xf32>
    %148 = arith.subf %142, %147 : vector<16x32xf32>
    %149 = arith.mulf %148, %148 : vector<16x32xf32>
    %cst_49 = arith.constant dense<0.000000e+00> : vector<16xf32>
    %150 = vector.multi_reduction <add>, %149, %cst_49 [1] : vector<16x32xf32> to vector<16xf32>
    %151 = vector.shape_cast %150 : vector<16xf32> to vector<16x1xf32>
    %cst_50 = arith.constant 3.200000e+01 : f32
    %152 = vector.broadcast %cst_50 : f32 to vector<16x1xf32>
    %153 = arith.divf %151, %152 : vector<16x1xf32>
    %154 = vector.broadcast %146 : vector<16x1xf32> to vector<16x32xf32>
    %155 = arith.subf %142, %154 : vector<16x32xf32>
    %cst_51 = arith.constant 9.99999996E-13 : f32
    %156 = vector.broadcast %cst_51 : f32 to vector<16x1xf32>
    %157 = arith.addf %153, %156 : vector<16x1xf32>
    %158 = math.rsqrt %157 : vector<16x1xf32>
    %159 = vector.broadcast %158 : vector<16x1xf32> to vector<16x32xf32>
    %160 = arith.mulf %155, %159 : vector<16x32xf32>
    %161 = vector.broadcast %56 : vector<1x32xf32> to vector<16x32xf32>
    %162 = arith.mulf %160, %161 : vector<16x32xf32>
    %163 = vector.broadcast %57 : vector<1x32xf32> to vector<16x32xf32>
    %164 = arith.addf %162, %163 : vector<16x32xf32>
    %165 = arith.truncf %164 : vector<16x32xf32> to vector<16x32xbf16>
    %cst_52 = arith.constant dense<0.000000e+00> : vector<16x64xf32>
    %166 = tpu.matmul %165, %52, %cst_52 {dimension_numbers = #tpu.dot_dimension_numbers<[1], [0], [0], [1], [0, 0, 1, 1], [], []>} : vector<16x32xbf16>, vector<32x64xbf16>, vector<16x64xf32> -> vector<16x64xf32>
    %167 = vector.broadcast %58 : vector<1x64xf32> to vector<16x64xf32>
    %168 = arith.addf %166, %167 : vector<16x64xf32>
    %169 = arith.mulf %168, %168 : vector<16x64xf32>
    %170 = arith.mulf %168, %169 : vector<16x64xf32>
    %cst_53 = arith.constant 4.471500e-02 : f32
    %171 = vector.broadcast %cst_53 : f32 to vector<16x64xf32>
    %172 = arith.mulf %171, %170 : vector<16x64xf32>
    %173 = arith.addf %168, %172 : vector<16x64xf32>
    %cst_54 = arith.constant 0.797884583 : f32
    %174 = vector.broadcast %cst_54 : f32 to vector<16x64xf32>
    %175 = arith.mulf %174, %173 : vector<16x64xf32>
    %176 = math.tanh %175 : vector<16x64xf32>
    %cst_55 = arith.constant 1.000000e+00 : f32
    %177 = vector.broadcast %cst_55 : f32 to vector<16x64xf32>
    %178 = arith.addf %177, %176 : vector<16x64xf32>
    %cst_56 = arith.constant 5.000000e-01 : f32
    %179 = vector.broadcast %cst_56 : f32 to vector<16x64xf32>
    %180 = arith.mulf %179, %178 : vector<16x64xf32>
    %181 = arith.mulf %168, %180 : vector<16x64xf32>
    %182 = arith.truncf %181 : vector<16x64xf32> to vector<16x64xbf16>
    %cst_57 = arith.constant dense<0.000000e+00> : vector<16x32xf32>
    %183 = tpu.matmul %182, %53, %cst_57 {dimension_numbers = #tpu.dot_dimension_numbers<[1], [0], [0], [1], [0, 0, 1, 1], [], []>} : vector<16x64xbf16>, vector<64x32xbf16>, vector<16x32xf32> -> vector<16x32xf32>
    %184 = vector.broadcast %59 : vector<1x32xf32> to vector<16x32xf32>
    %185 = arith.addf %183, %184 : vector<16x32xf32>
    %186 = arith.addf %185, %164 : vector<16x32xf32>
    %cst_58 = arith.constant dense<0.000000e+00> : vector<16xf32>
    %187 = vector.multi_reduction <add>, %186, %cst_58 [1] : vector<16x32xf32> to vector<16xf32>
    %188 = vector.shape_cast %187 : vector<16xf32> to vector<16x1xf32>
    %cst_59 = arith.constant 3.200000e+01 : f32
    %189 = vector.broadcast %cst_59 : f32 to vector<16x1xf32>
    %190 = arith.divf %188, %189 : vector<16x1xf32>
    %191 = vector.broadcast %190 : vector<16x1xf32> to vector<16x32xf32>
    %192 = arith.subf %186, %191 : vector<16x32xf32>
    %193 = arith.mulf %192, %192 : vector<16x32xf32>
    %cst_60 = arith.constant dense<0.000000e+00> : vector<16xf32>
    %194 = vector.multi_reduction <add>, %193, %cst_60 [1] : vector<16x32xf32> to vector<16xf32>
    %195 = vector.shape_cast %194 : vector<16xf32> to vector<16x1xf32>
    %cst_61 = arith.constant 3.200000e+01 : f32
    %196 = vector.broadcast %cst_61 : f32 to vector<16x1xf32>
    %197 = arith.divf %195, %196 : vector<16x1xf32>
    %198 = vector.broadcast %190 : vector<16x1xf32> to vector<16x32xf32>
    %199 = arith.subf %186, %198 : vector<16x32xf32>
    %cst_62 = arith.constant 9.99999996E-13 : f32
    %200 = vector.broadcast %cst_62 : f32 to vector<16x1xf32>
    %201 = arith.addf %197, %200 : vector<16x1xf32>
    %202 = math.rsqrt %201 : vector<16x1xf32>
    %203 = vector.broadcast %202 : vector<16x1xf32> to vector<16x32xf32>
    %204 = arith.mulf %199, %203 : vector<16x32xf32>
    %205 = vector.broadcast %60 : vector<1x32xf32> to vector<16x32xf32>
    %206 = arith.mulf %204, %205 : vector<16x32xf32>
    %207 = vector.broadcast %61 : vector<1x32xf32> to vector<16x32xf32>
    %208 = arith.addf %206, %207 : vector<16x32xf32>
    %c1_63 = arith.constant 1 : index
    %c0_64 = arith.constant 0 : index
    %c0_65 = arith.constant 0 : index
    %209 = vector.load %arg4[%c1_63, %c0_64, %c0_65] : memref<2x160x96xbf16, #tpu.memory_space<vmem>>, vector<1x160x96xbf16>
    %210 = vector.shape_cast %209 : vector<1x160x96xbf16> to vector<160x96xbf16>
    %c1_66 = arith.constant 1 : index
    %c0_67 = arith.constant 0 : index
    %c0_68 = arith.constant 0 : index
    %211 = vector.load %arg5[%c1_66, %c0_67, %c0_68] : memref<2x8x96xf32, #tpu.memory_space<vmem>>, vector<1x8x96xf32>
    %212 = vector.shape_cast %211 : vector<1x8x96xf32> to vector<8x96xf32>
    %213 = vector.extract_strided_slice %210 {offsets = [0, 0], sizes = [32, 96], strides = [1, 1]} : vector<160x96xbf16> to vector<32x96xbf16>
    %214 = vector.extract_strided_slice %210 {offsets = [32, 0], sizes = [32, 32], strides = [1, 1]} : vector<160x96xbf16> to vector<32x32xbf16>
    %215 = vector.extract_strided_slice %210 {offsets = [64, 0], sizes = [32, 64], strides = [1, 1]} : vector<160x96xbf16> to vector<32x64xbf16>
    %216 = vector.extract_strided_slice %210 {offsets = [96, 0], sizes = [64, 32], strides = [1, 1]} : vector<160x96xbf16> to vector<64x32xbf16>
    %217 = vector.extract_strided_slice %212 {offsets = [0, 0], sizes = [1, 96], strides = [1, 1]} : vector<8x96xf32> to vector<1x96xf32>
    %218 = vector.extract_strided_slice %212 {offsets = [1, 0], sizes = [1, 32], strides = [1, 1]} : vector<8x96xf32> to vector<1x32xf32>
    %219 = vector.extract_strided_slice %212 {offsets = [2, 0], sizes = [1, 32], strides = [1, 1]} : vector<8x96xf32> to vector<1x32xf32>
    %220 = vector.extract_strided_slice %212 {offsets = [3, 0], sizes = [1, 32], strides = [1, 1]} : vector<8x96xf32> to vector<1x32xf32>
    %221 = vector.extract_strided_slice %212 {offsets = [4, 0], sizes = [1, 64], strides = [1, 1]} : vector<8x96xf32> to vector<1x64xf32>
    %222 = vector.extract_strided_slice %212 {offsets = [5, 0], sizes = [1, 32], strides = [1, 1]} : vector<8x96xf32> to vector<1x32xf32>
    %223 = vector.extract_strided_slice %212 {offsets = [6, 0], sizes = [1, 32], strides = [1, 1]} : vector<8x96xf32> to vector<1x32xf32>
    %224 = vector.extract_strided_slice %212 {offsets = [7, 0], sizes = [1, 32], strides = [1, 1]} : vector<8x96xf32> to vector<1x32xf32>
    %225 = arith.truncf %208 : vector<16x32xf32> to vector<16x32xbf16>
    %cst_69 = arith.constant dense<0.000000e+00> : vector<16x96xf32>
    %226 = tpu.matmul %225, %213, %cst_69 {dimension_numbers = #tpu.dot_dimension_numbers<[1], [0], [0], [1], [0, 0, 1, 1], [], []>} : vector<16x32xbf16>, vector<32x96xbf16>, vector<16x96xf32> -> vector<16x96xf32>
    %227 = vector.broadcast %217 : vector<1x96xf32> to vector<16x96xf32>
    %228 = arith.addf %226, %227 : vector<16x96xf32>
    %229 = vector.extract_strided_slice %228 {offsets = [0, 0], sizes = [16, 32], strides = [1, 1]} : vector<16x96xf32> to vector<16x32xf32>
    %230 = vector.extract_strided_slice %228 {offsets = [0, 32], sizes = [16, 32], strides = [1, 1]} : vector<16x96xf32> to vector<16x32xf32>
    %231 = vector.extract_strided_slice %228 {offsets = [0, 64], sizes = [16, 32], strides = [1, 1]} : vector<16x96xf32> to vector<16x32xf32>
    %232 = vector.extract_strided_slice %229 {offsets = [0, 0], sizes = [16, 8], strides = [1, 1]} : vector<16x32xf32> to vector<16x8xf32>
    %233 = vector.extract_strided_slice %230 {offsets = [0, 0], sizes = [16, 8], strides = [1, 1]} : vector<16x32xf32> to vector<16x8xf32>
    %234 = vector.extract_strided_slice %231 {offsets = [0, 0], sizes = [16, 8], strides = [1, 1]} : vector<16x32xf32> to vector<16x8xf32>
    %cst_70 = arith.constant dense<0.000000e+00> : vector<16x16xf32>
    %235 = tpu.matmul %232, %233, %cst_70 {dimension_numbers = #tpu.dot_dimension_numbers<[1], [1], [0], [0], [0, 0, 1, 0], [], []>} : vector<16x8xf32>, vector<16x8xf32>, vector<16x16xf32> -> vector<16x16xf32>
    %236 = arith.addf %235, %45 : vector<16x16xf32>
    %cst_71 = arith.constant dense<0xFF800000> : vector<16xf32>
    %237 = vector.multi_reduction <maximumf>, %236, %cst_71 [1] : vector<16x16xf32> to vector<16xf32>
    %238 = vector.shape_cast %237 : vector<16xf32> to vector<16x1xf32>
    %239 = vector.broadcast %238 : vector<16x1xf32> to vector<16x16xf32>
    %240 = arith.subf %236, %239 : vector<16x16xf32>
    %241 = math.exp %240 : vector<16x16xf32>
    %cst_72 = arith.constant dense<0.000000e+00> : vector<16xf32>
    %242 = vector.multi_reduction <add>, %241, %cst_72 [1] : vector<16x16xf32> to vector<16xf32>
    %243 = vector.shape_cast %242 : vector<16xf32> to vector<16x1xf32>
    %244 = tpu.reciprocal %243 {approx = true} : vector<16x1xf32> -> vector<16x1xf32>
    %245 = vector.broadcast %244 : vector<16x1xf32> to vector<16x16xf32>
    %246 = arith.mulf %241, %245 : vector<16x16xf32>
    %cst_73 = arith.constant dense<0.000000e+00> : vector<16x8xf32>
    %247 = tpu.matmul %246, %234, %cst_73 {dimension_numbers = #tpu.dot_dimension_numbers<[1], [0], [0], [1], [0, 0, 1, 1], [], []>} : vector<16x16xf32>, vector<16x8xf32>, vector<16x8xf32> -> vector<16x8xf32>
    %c0_74 = arith.constant 0 : index
    %c0_75 = arith.constant 0 : index
    %248 = vector.load %arg9[%c0_74, %c0_75] : memref<16x32xf32, #tpu.memory_space<vmem>>, vector<16x8xf32>
    tpu.vector_store %arg9[%c0_74, %c0_75], %247 {strides = array<i32>} : memref<16x32xf32, #tpu.memory_space<vmem>>, vector<16x8xf32>,
    %249 = vector.extract_strided_slice %229 {offsets = [0, 8], sizes = [16, 8], strides = [1, 1]} : vector<16x32xf32> to vector<16x8xf32>
    %250 = vector.extract_strided_slice %230 {offsets = [0, 8], sizes = [16, 8], strides = [1, 1]} : vector<16x32xf32> to vector<16x8xf32>
    %251 = vector.extract_strided_slice %231 {offsets = [0, 8], sizes = [16, 8], strides = [1, 1]} : vector<16x32xf32> to vector<16x8xf32>
    %cst_76 = arith.constant dense<0.000000e+00> : vector<16x16xf32>
    %252 = tpu.matmul %249, %250, %cst_76 {dimension_numbers = #tpu.dot_dimension_numbers<[1], [1], [0], [0], [0, 0, 1, 0], [], []>} : vector<16x8xf32>, vector<16x8xf32>, vector<16x16xf32> -> vector<16x16xf32>
    %253 = arith.addf %252, %45 : vector<16x16xf32>
    %cst_77 = arith.constant dense<0xFF800000> : vector<16xf32>
    %254 = vector.multi_reduction <maximumf>, %253, %cst_77 [1] : vector<16x16xf32> to vector<16xf32>
    %255 = vector.shape_cast %254 : vector<16xf32> to vector<16x1xf32>
    %256 = vector.broadcast %255 : vector<16x1xf32> to vector<16x16xf32>
    %257 = arith.subf %253, %256 : vector<16x16xf32>
    %258 = math.exp %257 : vector<16x16xf32>
    %cst_78 = arith.constant dense<0.000000e+00> : vector<16xf32>
    %259 = vector.multi_reduction <add>, %258, %cst_78 [1] : vector<16x16xf32> to vector<16xf32>
    %260 = vector.shape_cast %259 : vector<16xf32> to vector<16x1xf32>
    %261 = tpu.reciprocal %260 {approx = true} : vector<16x1xf32> -> vector<16x1xf32>
    %262 = vector.broadcast %261 : vector<16x1xf32> to vector<16x16xf32>
    %263 = arith.mulf %258, %262 : vector<16x16xf32>
    %cst_79 = arith.constant dense<0.000000e+00> : vector<16x8xf32>
    %264 = tpu.matmul %263, %251, %cst_79 {dimension_numbers = #tpu.dot_dimension_numbers<[1], [0], [0], [1], [0, 0, 1, 1], [], []>} : vector<16x16xf32>, vector<16x8xf32>, vector<16x8xf32> -> vector<16x8xf32>
    %c0_80 = arith.constant 0 : index
    %c8_81 = arith.constant 8 : index
    %265 = vector.load %arg9[%c0_80, %c8_81] : memref<16x32xf32, #tpu.memory_space<vmem>>, vector<16x8xf32>
    tpu.vector_store %arg9[%c0_80, %c8_81], %264 {strides = array<i32>} : memref<16x32xf32, #tpu.memory_space<vmem>>, vector<16x8xf32>,
    %266 = vector.extract_strided_slice %229 {offsets = [0, 16], sizes = [16, 8], strides = [1, 1]} : vector<16x32xf32> to vector<16x8xf32>
    %267 = vector.extract_strided_slice %230 {offsets = [0, 16], sizes = [16, 8], strides = [1, 1]} : vector<16x32xf32> to vector<16x8xf32>
    %268 = vector.extract_strided_slice %231 {offsets = [0, 16], sizes = [16, 8], strides = [1, 1]} : vector<16x32xf32> to vector<16x8xf32>
    %cst_82 = arith.constant dense<0.000000e+00> : vector<16x16xf32>
    %269 = tpu.matmul %266, %267, %cst_82 {dimension_numbers = #tpu.dot_dimension_numbers<[1], [1], [0], [0], [0, 0, 1, 0], [], []>} : vector<16x8xf32>, vector<16x8xf32>, vector<16x16xf32> -> vector<16x16xf32>
    %270 = arith.addf %269, %45 : vector<16x16xf32>
    %cst_83 = arith.constant dense<0xFF800000> : vector<16xf32>
    %271 = vector.multi_reduction <maximumf>, %270, %cst_83 [1] : vector<16x16xf32> to vector<16xf32>
    %272 = vector.shape_cast %271 : vector<16xf32> to vector<16x1xf32>
    %273 = vector.broadcast %272 : vector<16x1xf32> to vector<16x16xf32>
    %274 = arith.subf %270, %273 : vector<16x16xf32>
    %275 = math.exp %274 : vector<16x16xf32>
    %cst_84 = arith.constant dense<0.000000e+00> : vector<16xf32>
    %276 = vector.multi_reduction <add>, %275, %cst_84 [1] : vector<16x16xf32> to vector<16xf32>
    %277 = vector.shape_cast %276 : vector<16xf32> to vector<16x1xf32>
    %278 = tpu.reciprocal %277 {approx = true} : vector<16x1xf32> -> vector<16x1xf32>
    %279 = vector.broadcast %278 : vector<16x1xf32> to vector<16x16xf32>
    %280 = arith.mulf %275, %279 : vector<16x16xf32>
    %cst_85 = arith.constant dense<0.000000e+00> : vector<16x8xf32>
    %281 = tpu.matmul %280, %268, %cst_85 {dimension_numbers = #tpu.dot_dimension_numbers<[1], [0], [0], [1], [0, 0, 1, 1], [], []>} : vector<16x16xf32>, vector<16x8xf32>, vector<16x8xf32> -> vector<16x8xf32>
    %c0_86 = arith.constant 0 : index
    %c16_87 = arith.constant 16 : index
    %282 = vector.load %arg9[%c0_86, %c16_87] : memref<16x32xf32, #tpu.memory_space<vmem>>, vector<16x8xf32>
    tpu.vector_store %arg9[%c0_86, %c16_87], %281 {strides = array<i32>} : memref<16x32xf32, #tpu.memory_space<vmem>>, vector<16x8xf32>,
    %283 = vector.extract_strided_slice %229 {offsets = [0, 24], sizes = [16, 8], strides = [1, 1]} : vector<16x32xf32> to vector<16x8xf32>
    %284 = vector.extract_strided_slice %230 {offsets = [0, 24], sizes = [16, 8], strides = [1, 1]} : vector<16x32xf32> to vector<16x8xf32>
    %285 = vector.extract_strided_slice %231 {offsets = [0, 24], sizes = [16, 8], strides = [1, 1]} : vector<16x32xf32> to vector<16x8xf32>
    %cst_88 = arith.constant dense<0.000000e+00> : vector<16x16xf32>
    %286 = tpu.matmul %283, %284, %cst_88 {dimension_numbers = #tpu.dot_dimension_numbers<[1], [1], [0], [0], [0, 0, 1, 0], [], []>} : vector<16x8xf32>, vector<16x8xf32>, vector<16x16xf32> -> vector<16x16xf32>
    %287 = arith.addf %286, %45 : vector<16x16xf32>
    %cst_89 = arith.constant dense<0xFF800000> : vector<16xf32>
    %288 = vector.multi_reduction <maximumf>, %287, %cst_89 [1] : vector<16x16xf32> to vector<16xf32>
    %289 = vector.shape_cast %288 : vector<16xf32> to vector<16x1xf32>
    %290 = vector.broadcast %289 : vector<16x1xf32> to vector<16x16xf32>
    %291 = arith.subf %287, %290 : vector<16x16xf32>
    %292 = math.exp %291 : vector<16x16xf32>
    %cst_90 = arith.constant dense<0.000000e+00> : vector<16xf32>
    %293 = vector.multi_reduction <add>, %292, %cst_90 [1] : vector<16x16xf32> to vector<16xf32>
    %294 = vector.shape_cast %293 : vector<16xf32> to vector<16x1xf32>
    %295 = tpu.reciprocal %294 {approx = true} : vector<16x1xf32> -> vector<16x1xf32>
    %296 = vector.broadcast %295 : vector<16x1xf32> to vector<16x16xf32>
    %297 = arith.mulf %292, %296 : vector<16x16xf32>
    %cst_91 = arith.constant dense<0.000000e+00> : vector<16x8xf32>
    %298 = tpu.matmul %297, %285, %cst_91 {dimension_numbers = #tpu.dot_dimension_numbers<[1], [0], [0], [1], [0, 0, 1, 1], [], []>} : vector<16x16xf32>, vector<16x8xf32>, vector<16x8xf32> -> vector<16x8xf32>
    %c0_92 = arith.constant 0 : index
    %c24_93 = arith.constant 24 : index
    %299 = vector.load %arg9[%c0_92, %c24_93] : memref<16x32xf32, #tpu.memory_space<vmem>>, vector<16x8xf32>
    tpu.vector_store %arg9[%c0_92, %c24_93], %298 {strides = array<i32>} : memref<16x32xf32, #tpu.memory_space<vmem>>, vector<16x8xf32>,
    %c0_94 = arith.constant 0 : index
    %c0_95 = arith.constant 0 : index
    %300 = vector.load %arg9[%c0_94, %c0_95] : memref<16x32xf32, #tpu.memory_space<vmem>>, vector<16x32xf32>
    %301 = arith.truncf %300 : vector<16x32xf32> to vector<16x32xbf16>
    %cst_96 = arith.constant dense<0.000000e+00> : vector<16x32xf32>
    %302 = tpu.matmul %301, %214, %cst_96 {dimension_numbers = #tpu.dot_dimension_numbers<[1], [0], [0], [1], [0, 0, 1, 1], [], []>} : vector<16x32xbf16>, vector<32x32xbf16>, vector<16x32xf32> -> vector<16x32xf32>
    %303 = vector.broadcast %218 : vector<1x32xf32> to vector<16x32xf32>
    %304 = arith.addf %302, %303 : vector<16x32xf32>
    %305 = arith.addf %304, %208 : vector<16x32xf32>
    %cst_97 = arith.constant dense<0.000000e+00> : vector<16xf32>
    %306 = vector.multi_reduction <add>, %305, %cst_97 [1] : vector<16x32xf32> to vector<16xf32>
    %307 = vector.shape_cast %306 : vector<16xf32> to vector<16x1xf32>
    %cst_98 = arith.constant 3.200000e+01 : f32
    %308 = vector.broadcast %cst_98 : f32 to vector<16x1xf32>
    %309 = arith.divf %307, %308 : vector<16x1xf32>
    %310 = vector.broadcast %309 : vector<16x1xf32> to vector<16x32xf32>
    %311 = arith.subf %305, %310 : vector<16x32xf32>
    %312 = arith.mulf %311, %311 : vector<16x32xf32>
    %cst_99 = arith.constant dense<0.000000e+00> : vector<16xf32>
    %313 = vector.multi_reduction <add>, %312, %cst_99 [1] : vector<16x32xf32> to vector<16xf32>
    %314 = vector.shape_cast %313 : vector<16xf32> to vector<16x1xf32>
    %cst_100 = arith.constant 3.200000e+01 : f32
    %315 = vector.broadcast %cst_100 : f32 to vector<16x1xf32>
    %316 = arith.divf %314, %315 : vector<16x1xf32>
    %317 = vector.broadcast %309 : vector<16x1xf32> to vector<16x32xf32>
    %318 = arith.subf %305, %317 : vector<16x32xf32>
    %cst_101 = arith.constant 9.99999996E-13 : f32
    %319 = vector.broadcast %cst_101 : f32 to vector<16x1xf32>
    %320 = arith.addf %316, %319 : vector<16x1xf32>
    %321 = math.rsqrt %320 : vector<16x1xf32>
    %322 = vector.broadcast %321 : vector<16x1xf32> to vector<16x32xf32>
    %323 = arith.mulf %318, %322 : vector<16x32xf32>
    %324 = vector.broadcast %219 : vector<1x32xf32> to vector<16x32xf32>
    %325 = arith.mulf %323, %324 : vector<16x32xf32>
    %326 = vector.broadcast %220 : vector<1x32xf32> to vector<16x32xf32>
    %327 = arith.addf %325, %326 : vector<16x32xf32>
    %328 = arith.truncf %327 : vector<16x32xf32> to vector<16x32xbf16>
    %cst_102 = arith.constant dense<0.000000e+00> : vector<16x64xf32>
    %329 = tpu.matmul %328, %215, %cst_102 {dimension_numbers = #tpu.dot_dimension_numbers<[1], [0], [0], [1], [0, 0, 1, 1], [], []>} : vector<16x32xbf16>, vector<32x64xbf16>, vector<16x64xf32> -> vector<16x64xf32>
    %330 = vector.broadcast %221 : vector<1x64xf32> to vector<16x64xf32>
    %331 = arith.addf %329, %330 : vector<16x64xf32>
    %332 = arith.mulf %331, %331 : vector<16x64xf32>
    %333 = arith.mulf %331, %332 : vector<16x64xf32>
    %cst_103 = arith.constant 4.471500e-02 : f32
    %334 = vector.broadcast %cst_103 : f32 to vector<16x64xf32>
    %335 = arith.mulf %334, %333 : vector<16x64xf32>
    %336 = arith.addf %331, %335 : vector<16x64xf32>
    %cst_104 = arith.constant 0.797884583 : f32
    %337 = vector.broadcast %cst_104 : f32 to vector<16x64xf32>
    %338 = arith.mulf %337, %336 : vector<16x64xf32>
    %339 = math.tanh %338 : vector<16x64xf32>
    %cst_105 = arith.constant 1.000000e+00 : f32
    %340 = vector.broadcast %cst_105 : f32 to vector<16x64xf32>
    %341 = arith.addf %340, %339 : vector<16x64xf32>
    %cst_106 = arith.constant 5.000000e-01 : f32
    %342 = vector.broadcast %cst_106 : f32 to vector<16x64xf32>
    %343 = arith.mulf %342, %341 : vector<16x64xf32>
    %344 = arith.mulf %331, %343 : vector<16x64xf32>
    %345 = arith.truncf %344 : vector<16x64xf32> to vector<16x64xbf16>
    %cst_107 = arith.constant dense<0.000000e+00> : vector<16x32xf32>
    %346 = tpu.matmul %345, %216, %cst_107 {dimension_numbers = #tpu.dot_dimension_numbers<[1], [0], [0], [1], [0, 0, 1, 1], [], []>} : vector<16x64xbf16>, vector<64x32xbf16>, vector<16x32xf32> -> vector<16x32xf32>
    %347 = vector.broadcast %222 : vector<1x32xf32> to vector<16x32xf32>
    %348 = arith.addf %346, %347 : vector<16x32xf32>
    %349 = arith.addf %348, %327 : vector<16x32xf32>
    %cst_108 = arith.constant dense<0.000000e+00> : vector<16xf32>
    %350 = vector.multi_reduction <add>, %349, %cst_108 [1] : vector<16x32xf32> to vector<16xf32>
    %351 = vector.shape_cast %350 : vector<16xf32> to vector<16x1xf32>
    %cst_109 = arith.constant 3.200000e+01 : f32
    %352 = vector.broadcast %cst_109 : f32 to vector<16x1xf32>
    %353 = arith.divf %351, %352 : vector<16x1xf32>
    %354 = vector.broadcast %353 : vector<16x1xf32> to vector<16x32xf32>
    %355 = arith.subf %349, %354 : vector<16x32xf32>
    %356 = arith.mulf %355, %355 : vector<16x32xf32>
    %cst_110 = arith.constant dense<0.000000e+00> : vector<16xf32>
    %357 = vector.multi_reduction <add>, %356, %cst_110 [1] : vector<16x32xf32> to vector<16xf32>
    %358 = vector.shape_cast %357 : vector<16xf32> to vector<16x1xf32>
    %cst_111 = arith.constant 3.200000e+01 : f32
    %359 = vector.broadcast %cst_111 : f32 to vector<16x1xf32>
    %360 = arith.divf %358, %359 : vector<16x1xf32>
    %361 = vector.broadcast %353 : vector<16x1xf32> to vector<16x32xf32>
    %362 = arith.subf %349, %361 : vector<16x32xf32>
    %cst_112 = arith.constant 9.99999996E-13 : f32
    %363 = vector.broadcast %cst_112 : f32 to vector<16x1xf32>
    %364 = arith.addf %360, %363 : vector<16x1xf32>
    %365 = math.rsqrt %364 : vector<16x1xf32>
    %366 = vector.broadcast %365 : vector<16x1xf32> to vector<16x32xf32>
    %367 = arith.mulf %362, %366 : vector<16x32xf32>
    %368 = vector.broadcast %223 : vector<1x32xf32> to vector<16x32xf32>
    %369 = arith.mulf %367, %368 : vector<16x32xf32>
    %370 = vector.broadcast %224 : vector<1x32xf32> to vector<16x32xf32>
    %371 = arith.addf %369, %370 : vector<16x32xf32>
    %372 = vector.extract_strided_slice %371 {offsets = [0, 0], sizes = [1, 32], strides = [1, 1]} : vector<16x32xf32> to vector<1x32xf32>
    %373 = vector.extract_strided_slice %371 {offsets = [8, 0], sizes = [1, 32], strides = [1, 1]} : vector<16x32xf32> to vector<1x32xf32>
    %374 = tpu.concatenate %372, %373 in 0 : vector<1x32xf32>, vector<1x32xf32> -> vector<2x32xf32>
    %375 = arith.truncf %374 : vector<2x32xf32> to vector<2x32xbf16>
    %c0_113 = arith.constant 0 : index
    %c0_114 = arith.constant 0 : index
    %376 = vector.load %arg6[%c0_113, %c0_114] : memref<32x128xbf16, #tpu.memory_space<vmem>>, vector<32x128xbf16>
    %cst_115 = arith.constant dense<0.000000e+00> : vector<2x128xf32>
    %377 = tpu.matmul %375, %376, %cst_115 {dimension_numbers = #tpu.dot_dimension_numbers<[1], [0], [0], [1], [0, 0, 1, 1], [], []>} : vector<2x32xbf16>, vector<32x128xbf16>, vector<2x128xf32> -> vector<2x128xf32>
    %c0_116 = arith.constant 0 : index
    %c0_117 = arith.constant 0 : index
    %378 = vector.load %arg7[%c0_116, %c0_117] : memref<1x128xf32, #tpu.memory_space<vmem>>, vector<1x128xf32>
    %379 = vector.broadcast %378 : vector<1x128xf32> to vector<2x128xf32>
    %380 = arith.addf %377, %379 : vector<2x128xf32>
    %c0_118 = arith.constant 0 : index
    %c0_119 = arith.constant 0 : index
    %381 = vector.load %arg8[%c0_118, %c0_119] : memref<2x128xf32, #tpu.memory_space<vmem>>, vector<2x128xf32>
    tpu.vector_store %arg8[%c0_118, %c0_119], %380 {strides = array<i32>} : memref<2x128xf32, #tpu.memory_space<vmem>>, vector<2x128xf32>,
    return
  }
}

</mosaic_0001>

<bundles_post_ra>
// kernel: tpu_custom_call.1
= control target key start
LH: loop header
LB: loop body
LE: loop exit
PB: predicated region body
PF: predicated region fallthrough
CT: control target
= control target key end

     0   :  { %13 = vsyncpa [#allocation4], 0  ;;  %s4029_s0 = inlined_call_operand.hbm [shape: f32[16,32], index: 0, kind: input, shape index: {}]   ;;  %s4030_s1 = inlined_call_operand.hbm [shape: f32[8,32], index: 1, kind: input, shape index: {}]   ;;  %s4031_s2 = inlined_call_operand.hbm [shape: f32[1,16], index: 2, kind: input, shape index: {}]   ;;  %s4032_s3 = inlined_call_operand.vmem [shape: f32[2,32], index: 3, kind: input, shape index: {}]   ;;  %s4033_s4 = inlined_call_operand.hbm [shape: bf16[2,160,96], index: 4, kind: input, shape index: {}]   ;;  %s4034_s5 = inlined_call_operand.vmem [shape: f32[2,8,96], index: 5, kind: input, shape index: {}]   ;;  %s4035_s6 = inlined_call_operand.hbm [shape: bf16[32,128], index: 6, kind: input, shape index: {}]   ;;  %s4036_s7 = inlined_call_operand.vmem [shape: f32[1,128], index: 7, kind: input, shape index: {}]   ;;  %s4037_s8 = inlined_call_operand.hbm [shape: f32[2,128], index: 8, kind: output, shape index: {}]  }
   0x1   :  { %14 = vsyncpa [#allocation7], 0 }
   0x2   :  { %15 = vsyncpa [#allocation10], 0 }
   0x3   :  { %16 = vsyncpa [#allocation5], 0  ;;  %s3483_s27 = smov [#allocation6]   ;;  %s3484_s29 = smov [#allocation9]  }
   0x4   :  { %s35_s28 = sshll.u32 %s3483_s27, 4  ;;  %s56_s30 = sshll.u32 %s3484_s29, 4  ;;  %s36_s28 = int_to_ptr.vmem [resolvable:$true] %s35_s28  ;;  %s3552_s30 = int_to_ptr.vmem [resolvable:$true] %s56_s30 }
   0x5   :  { %s3343_s11 = scalar_lea.hbm %s4030_s1, 128 }
   0x6   :  { %p3344_p0 = scmp.ne.s32.totalorder %s4030_s1, %s3343_s11  ;;  %p3347_p1 = scmp.lt.u32.totalorder %s3343_s11, %s4030_s1 }
   0x8   :  { %p3349_p2 = pnand %p3347_p1, %p3344_p0 }
   0xa   :  { %3352 = shalt.err (!%p3349_p2)
}
   0xb   :  { %s3353_s16 = scalar_lea.vmem %s36_s28, 128  ;;  %p3358_p4 = scmp.lt.s32.totalorder %s36_s28, %s36_s28 }
   0xc   :  { %p3354_p3 = scmp.ne.s32.totalorder %s36_s28, %s3353_s16  ;;  %p3359_p5 = scmp.lt.s32.totalorder %s3353_s16, %s3353_s16 }
   0xe   :  { %p3360_p6 = por %p3359_p5, %p3358_p4 }
  0x10   :  { %p3361_p7 = pnand %p3360_p6, %p3354_p3 }
  0x12   :  { %3364 = shalt.err (!%p3361_p7)
}
  0x13   :  { %38 = dma.hbm_to_vmem [thread:$0]  %s4030_s1, 128, %s36_s28, [#allocation7]  }
  0x14   :  { %s3365_s21 = scalar_lea.hbm %s4033_s4, 2560 }
  0x15   :  { %p3366_p8 = scmp.ne.s32.totalorder %s4033_s4, %s3365_s21  ;;  %p3369_p9 = scmp.lt.u32.totalorder %s3365_s21, %s4033_s4 }
  0x17   :  { %p3371_p10 = pnand %p3369_p9, %p3366_p8 }
  0x19   :  { %3374 = shalt.err (!%p3371_p10)
}
  0x1a   :  { %s3375_s26 = scalar_lea.vmem %s3552_s30, 2560  ;;  %p3380_p12 = scmp.lt.s32.totalorder %s3552_s30, %s3552_s30 }
  0x1b   :  { %p3376_p11 = scmp.ne.s32.totalorder %s3552_s30, %s3375_s26  ;;  %p3381_p13 = scmp.lt.s32.totalorder %s3375_s26, %s3375_s26 }
  0x1d   :  { %p3382_p0 = por %p3381_p13, %p3380_p12 }
  0x1f   :  { %p3383_p1 = pnand %p3382_p0, %p3376_p11 }
  0x21   :  { %3386 = shalt.err (!%p3383_p1)
}
  0x22   :  { %s3485_s1 = smov 64   ;;  %s3486_s27 = smov 4  }
  0x23   :  { %62 = dma.hbm_to_vmem [thread:$0]  %s4033_s4, 2560, %s3552_s30, [#allocation10], %s3485_s1, %s3485_s1, %s3486_s27  }
  0x24   :  { %s3487_s9 = smov [#allocation3]   ;;  %s3387_s13 = scalar_lea.hbm %s4029_s0, 256 }
  0x25   :  { %s22_s10 = sshll.u32 %s3487_s9, 4  ;;  %p3388_p2 = scmp.ne.s32.totalorder %s4029_s0, %s3387_s13  ;;  %s23_s10 = int_to_ptr.vmem [resolvable:$true] %s22_s10 }
  0x26   :  { %p3391_p3 = scmp.lt.u32.totalorder %s3387_s13, %s4029_s0 }
  0x28   :  { %p3393_p4 = pnand %p3391_p3, %p3388_p2 }
  0x2a   :  { %3396 = shalt.err (!%p3393_p4)
}
  0x2b   :  { %s3397_s18 = scalar_lea.vmem %s23_s10, 256  ;;  %p3402_p6 = scmp.lt.s32.totalorder %s23_s10, %s23_s10 }
  0x2c   :  { %p3398_p5 = scmp.ne.s32.totalorder %s23_s10, %s3397_s18  ;;  %p3403_p7 = scmp.lt.s32.totalorder %s3397_s18, %s3397_s18 }
  0x2e   :  { %p3404_p8 = por %p3403_p7, %p3402_p6 }
  0x30   :  { %p3405_p9 = pnand %p3404_p8, %p3398_p5 }
  0x32   :  { %3408 = shalt.err (!%p3405_p9)
}
  0x33   :  { %s3488_s4 = smov 128   ;;  %s3489_s30 = smov 8  }
  0x34   :  { %28 = dma.hbm_to_vmem [thread:$0]  %s4029_s0, 256, %s23_s10, [#allocation4], %s3488_s4, %s3488_s4, %s3489_s30  }
  0x35   :  { %s3490_s21 = smov [#allocation8]   ;;  %s3491_s23 = smov [#allocation11]  }
  0x36   :  { %s45_s22 = sshll.u32 %s3490_s21, 4  ;;  %s70_s24 = sshll.u32 %s3491_s23, 4  ;;  %s46_s22 = int_to_ptr.vmem [resolvable:$true] %s45_s22  ;;  %s71_s24 = int_to_ptr.vmem [resolvable:$true] %s70_s24 }
  0x37   :  { %s3409_s28 = scalar_lea.hbm %s4031_s2, 16 }
  0x38   :  { %p3410_p10 = scmp.ne.s32.totalorder %s4031_s2, %s3409_s28  ;;  %p3413_p11 = scmp.lt.u32.totalorder %s3409_s28, %s4031_s2 }
  0x3a   :  { %p3415_p12 = pnand %p3413_p11, %p3410_p10 }
  0x3c   :  { %3418 = shalt.err (!%p3415_p12)
}
  0x3d   :  { %s3419_s0 = scalar_lea.vmem %s46_s22, 16  ;;  %s3423_s10 = scalar_lea.vmem %s46_s22, 32 }
  0x3e   :  { %p3420_p13 = scmp.ne.s32.totalorder %s46_s22, %s3419_s0  ;;  %p3424_p0 = scmp.lt.s32.totalorder %s46_s22, %s46_s22 }
  0x3f   :  { %p3425_p1 = scmp.lt.s32.totalorder %s3423_s10, %s3419_s0 }
  0x41   :  { %p3426_p2 = por %p3425_p1, %p3424_p0 }
  0x43   :  { %p3427_p3 = pnand %p3426_p2, %p3420_p13 }
  0x45   :  { %3430 = shalt.err (!%p3427_p3)
}
  0x46   :  { %48 = dma.hbm_to_vmem [thread:$0]  %s4031_s2, 16, %s46_s22, [#allocation7]  }
  0x47   :  { %s3431_s17 = scalar_lea.hbm %s4035_s6, 256 }
  0x48   :  { %p3432_p4 = scmp.ne.s32.totalorder %s4035_s6, %s3431_s17  ;;  %p3435_p5 = scmp.lt.u32.totalorder %s3431_s17, %s4035_s6 }
  0x4a   :  { %p3437_p6 = pnand %p3435_p5, %p3432_p4 }
  0x4c   :  { %3440 = shalt.err (!%p3437_p6)
}
  0x4d   :  { %s3441_s21 = scalar_lea.vmem %s71_s24, 256  ;;  %p3446_p8 = scmp.lt.s32.totalorder %s71_s24, %s71_s24 }
  0x4e   :  { %p3442_p7 = scmp.ne.s32.totalorder %s71_s24, %s3441_s21  ;;  %p3447_p9 = scmp.lt.s32.totalorder %s3441_s21, %s3441_s21 }
  0x50   :  { %p3448_p10 = por %p3447_p9, %p3446_p8 }
  0x52   :  { %p3449_p11 = pnand %p3448_p10, %p3442_p7 }
  0x54   :  { %3452 = shalt.err (!%p3449_p11)
}
  0x55   :  { %76 = dma.hbm_to_vmem [thread:$0]  %s4035_s6, 256, %s71_s24, [#allocation10], %s3485_s1, %s3485_s1, %s3486_s27  }
  0x56   :  { %3475 = dma.done.wait [#allocation4], 256  }
  0x57   :  { %3476 = vsyncadd [#allocation4], 4294967040 }
  0x58   :  { %3477 = dma.done.wait [#allocation7], 144  }
  0x59   :  { %3478 = vsyncadd [#allocation7], 4294967152 }
  0x5a   :  { %3479 = dma.done.wait [#allocation10], 2816  }
  0x5b   :  { %3480 = vsyncadd [#allocation10], 4294964480  ;;  %v95_v0 = vld [vmem:[#allocation6] sm:$0xff]  ;;  %v96_v1 = vld [vmem:[#allocation3] sm:$0xff]  ;;  %vm102_vm0 = vcmask 261120   ;;  %v3492_v18 = vmov 0.0   ;;  %v145_v37 = vlaneseq }
  0x5c   :  { %v97_v2 = vld [vmem:[#allocation3 + $0x8] sm:$0xff]  ;;  %v98_v3 = vadd.f32 %v96_v1, %v95_v0  ;;  %v3229_v17 = vld [vmem:[#allocation9] sm:$0xff]   ;;  %2853 = vmatprep.subr.bf16.mxu0 %v3492_v18  ;;  %vm3493_vm1 = vmmov 0   ;;  %v2675_v28 = vld [vmem:[%s4032_s3] ss:$0 sm:$0xff]  ;;  %vm251_vm2 = vcmask 64512  }
  0x5d   :  { %v99_v4 = vadd.f32 %v97_v2, %v95_v0  ;;  %2854 = vmatpush3.bf16.msra.mxu0 %v3229_v17  ;;  %v3230_v19 = vld [vmem:[#allocation9 + $0x8] sm:$0xff]   ;;  %2857 = vmatprep.mubr.msk.bf16.mxu0 %vm3493_vm1, %v3492_v18  ;;  %v2676_v32 = vld [vmem:[%s4032_s3 + $0x1] ss:$0 sm:$0xff]  ;;  %v3647_v38 = vshrl.u32 %v145_v37, 7  ;;  %s3494_s3 = smov 88   ;;  %s3495_s28 = smov 96   ;;  %vm3685_vm3 = vmpackc.low %vm251_vm2, %vm251_vm2 }
  0x5e   :  { %v103_v5 = vsel %vm102_vm0, %v98_v3, 0.0  ;;  %2855 = vmatprep.subr.bf16.mxu0 %v3492_v18  ;;  %v3655_v40 = vld [vmem:[%s4034_s5] sm:$0xff]  ;;  %s3496_s29 = smov 120   ;;  %s3497_s9 = smov 80   ;;  %v142_v2 = vld [vmem:[#allocation8] sm:$0x1] }
  0x5f   :  { %v106_v6 = vsel %vm102_vm0, %v99_v4, 0.0  ;;  %104 = vadd.xlane.f32.xlu0 %v103_v5  ;;  %v3650_v39 = vsub.s32 0, %v3647_v38  ;;  %s3498_s11 = smov 112   ;;  %v151_v5 = vand.u32 127, %v145_v37  ;;  %vm335_vm6 = vcmask 130048   ;;  %s3499_s12 = smov 48  }
  0x60   :  { %s3500_s0 = smov 72   ;;  %s3501_s10 = smov 56   ;;  %vm655_vm7 = vcmask 130112   ;;  %vm866_vm8 = vcmask 195712   ;;  %vm1077_vm9 = vcmask 261312   ;;  %vm1291_vm10 = vcmask 523264  }
  0x61   :  { %2856 = vmatpush3.bf16.msra.mxu0 %v3230_v19  ;;  %v188_v41 = vrot.slane %v3655_v40, %v3650_v39  ;;  %s3502_s13 = smov 104   ;;  %s3503_s14 = smov 40   ;;  %vm2588_vm11 = vcmask 1040384  }
  0x62   :  { %s3504_s15 = smov 16   ;;  %s3505_s16 = smov 24  }
  0x63   :  { %107 = vadd.xlane.f32.xlu0 %v106_v6 }
  0xec   :  { %v105_v7 = vpop.xlane.xlu0 %104 }
  0xed   :  { %v110_v8 = vmul.f32 0.03125, %v105_v7 }
  0xef   :  { %v112_v9 = vsub.f32 %v98_v3, %v110_v8  ;;  %v143_v3 = vsub.f32 1.0, %v142_v2  ;;  %v152_v8 = vshra.s32 %v151_v5, 3 }
  0xf0   :  { %v108_v10 = vpop.xlane.xlu0 %107 }
  0xf1   :  { %v111_v11 = vmul.f32 0.03125, %v108_v10  ;;  %v114_v12 = vmul.f32 %v112_v9, %v112_v9  ;;  %v144_v6 = vmul.f32 -1e+09, %v143_v3 }
  0xf3   :  { %v113_v13 = vsub.f32 %v99_v4, %v111_v11  ;;  %v116_v14 = vsel %vm102_vm0, %v114_v12, 0.0  ;;  %v147_v4 = vadd.s32 8, %v3647_v38  ;;  %v159_v10 = vrot.slane %v144_v6, %v3650_v39 }
  0xf4   :  { %117 = vadd.xlane.f32.xlu1 %v116_v14 }
  0xf5   :  { %v115_v15 = vmul.f32 %v113_v13, %v113_v13  ;;  %v149_v7 = vshra.s32 %v147_v4, 3 }
  0xf7   :  { %v119_v16 = vsel %vm102_vm0, %v115_v15, 0.0  ;;  %vm154_vm4 = vcmp.eq.s32.totalorder %v149_v7, %v152_v8 }
  0xf8   :  { %120 = vadd.xlane.f32.xlu1 %v119_v16  ;;  %v3713_v11 = vsel %vm154_vm4, %v159_v10, -1e+09 }
 0x181   :  { %v118_v20 = vpop.xlane.xlu1 %117 }
 0x182   :  { %v122_v21 = vmul.f32 0.03125, %v118_v20 }
 0x184   :  { %v124_v22 = vadd.f32 1e-12, %v122_v21 }
 0x185   :  { %v121_v23 = vpop.xlane.xlu1 %120 }
 0x186   :  { %3251 = vrsqrt.f32 %v124_v22  ;;  %v123_v24 = vmul.f32 0.03125, %v121_v23 }
 0x188   :  { %v125_v25 = vadd.f32 1e-12, %v123_v24 }
 0x18a   :  { %3253 = vrsqrt.f32 %v125_v25 }
 0x190   :  { %v3252_v26 = vpop.eup %3251 }
 0x191   :  { %v128_v27 = vmul.f32 %v3252_v26, %v112_v9  ;;  %v148_v9 = vshra.s32 %v3647_v38, 3 }
 0x193   :  { %v134_v31 = vmul.f32 %v2675_v28, %v128_v27  ;;  %vm153_vm5 = vcmp.eq.s32.totalorder %v148_v9, %v152_v8 }
 0x194   :  { %v3254_v29 = vpop.eup %3253  ;;  %v3715_v12 = vsel %vm153_vm5, %v159_v10, -1e+09 }
 0x195   :  { %v129_v30 = vmul.f32 %v3254_v29, %v113_v13  ;;  %v3640_v34 = vadd.f32 %v2676_v32, %v134_v31 }
 0x197   :  { %v135_v33 = vmul.f32 %v2675_v28, %v129_v30 }
 0x199   :  { %v3642_v35 = vadd.f32 %v2676_v32, %v135_v33 }
 0x19b   :  { %v184_v36 = vpack.c.bf16 %v3642_v35, %v3640_v34 }
 0x19d   :  { %2858 = vmatmul.mubr.msk.bf16.vlgmr.msra.gmra.mrb[0].mxu0 %vm102_vm0, %v184_v36 }
 0x270   :  { %v238_v42 = vpop.f32.mrb[0].mxu0 }
 0x271   :  { %v3659_v43 = vadd.f32 %v238_v42, %v188_v41  ;;  %v2859_v44 = vpop.f32.mrb[1].mxu0 }
 0x272   :  { %v241_v45 = vpop.f32.mrb[2].mxu0 }
 0x273   :  { %v3661_v46 = vadd.f32 %v241_v45, %v188_v41  ;;  %v2860_v47 = vpop.f32.mrb[3].mxu0  ;;  %2865 = vmatprep.mubr.msk.f32.mxu1 %vm251_vm2, %v3659_v43 }
 0x275   :  { %v3667_v48 = vpack.i.bf16 %v3661_v46, %v3659_v43 }
 0x277   :  { %3155 = vrot.lane.b32.xlu1 %v3667_v48, %s3494_s3  ;;  %3150 = vrot.lane.b32.xlu0 %v3667_v48, %s3495_s28 }
 0x27b   :  { %447 = vrot.lane.b32.xlu1 %v3659_v43, %s3496_s29  ;;  %449 = vrot.lane.b32.xlu0 %v3661_v46, %s3496_s29 }
 0x27f   :  { %3160 = vrot.lane.b32.xlu1 %v3667_v48, %s3497_s9  ;;  %660 = vrot.lane.b32.xlu0 %v3661_v46, %s3498_s11 }
 0x283   :  { %658 = vrot.lane.b32.xlu1 %v3659_v43, %s3498_s11 }
 0x2e9   :  { %v3156_v49 = vpop.permute.xlu1 %3155  ;;  %v3151_v50 = vpop.permute.xlu0 %3150 }
 0x2ea   :  { %v3158_v51 = vunpack.i.h.bf16 %v3156_v49  ;;  %v3157_v52 = vunpack.i.l.bf16 %v3156_v49  ;;  %v3153_v53 = vunpack.i.h.bf16 %v3151_v50  ;;  %v3152_v54 = vunpack.i.l.bf16 %v3151_v50 }
 0x2ec   :  { %v3055_v56 = vpack.c.bf16 %v3158_v51, %v3157_v52  ;;  %v3045_v57 = vpack.c.bf16 %v3153_v53, %v3152_v54 }
 0x2ed   :  { %v448_v58 = vpop.permute.xlu1 %447  ;;  %v450_v0 = vpop.permute.xlu0 %449 }
 0x2ee   :  { %3047 = vmatprep.subr.msk.bf16.mxu1 %vm3685_vm3, %v3045_v57  ;;  %3057 = vmatprep.subr.msk.bf16.mxu0 %vm3685_vm3, %v3055_v56 }
 0x2ef   :  { %2879 = vmatprep.mubr.msk.f32.mxu0 %vm251_vm2, %v448_v58  ;;  %3050 = vmatpush3.bf16.xpose.msk.msra.mxu1 %vm3685_vm3, %v3045_v57 }
 0x2f0   :  { %3060 = vmatpush3.bf16.xpose.msk.msra.mxu0 %vm3685_vm3, %v3055_v56 }
 0x2f1   :  { %v3161_v59 = vpop.permute.xlu1 %3160  ;;  %v661_v1 = vpop.permute.xlu0 %660 }
 0x2f2   :  { %v3163_v60 = vunpack.i.h.bf16 %v3161_v59  ;;  %v3162_v61 = vunpack.i.l.bf16 %v3161_v59 }
 0x2f4   :  { %v3065_v62 = vpack.c.bf16 %v3163_v60, %v3162_v61 }
 0x2f5   :  { %v659_v63 = vpop.permute.xlu1 %658 }
 0x2f6   :  { %2866 = vmatmul.mubr.msk.f32.vlgmr.msra.gmra.mrb[0].mxu1 %vm251_vm2, %v3661_v46  ;;  %3067 = vmatprep.subr.msk.bf16.mxu0 %vm3685_vm3, %v3065_v62 }
 0x2f7   :  { %2880 = vmatmul.mubr.msk.f32.vlgmr.msra.gmra.mrb[4].mxu0 %vm251_vm2, %v450_v0 }
 0x2f8   :  { %3070 = vmatpush3.bf16.xpose.msk.msra.mxu0 %vm3685_vm3, %v3065_v62  ;;  %2893 = vmatprep.mubr.msk.f32.mxu0 %vm251_vm2, %v659_v63 }
 0x2f9   :  { %2917 = vmatprep.subr.bf16.mxu0 %v3492_v18 }
 0x2ff   :  { %2894 = vmatmul.mubr.msk.f32.vlgmr.msra.gmra.mrb[6].mxu0 %vm251_vm2, %v661_v1 }
 0x300   :  { %2921 = vmatprep.mubr.msk.bf16.mxu0 %vm3493_vm1, %v3492_v18 }
 0x3c9   :  { %v2867_v13 = vpop.f32.mrb[0].mxu1 }
 0x3ca   :  { %v332_v14 = vadd.f32 %v2867_v13, %v3713_v11  ;;  %v2881_v15 = vpop.f32.mrb[4].mxu0  ;;  %v326_v16 = vpop.f32.mrb[1].mxu1 }
 0x3cb   :  { %v327_v17 = vadd.f32 %v326_v16, %v3715_v12  ;;  %v529_v19 = vpop.f32.mrb[5].mxu0  ;;  %v535_v23 = vadd.f32 %v2881_v15, %v3713_v11 }
 0x3cc   :  { %v530_v20 = vadd.f32 %v529_v19, %v3715_v12  ;;  %v339_v21 = vsel %vm335_vm6, %v332_v14, -inf }
 0x3cd   :  { %340 = vmax.xlane.f32.xlu0 %v339_v21  ;;  %v336_v22 = vsel %vm335_vm6, %v327_v17, -inf  ;;  %v541_v29 = vsel %vm335_vm6, %v535_v23, -inf }
 0x3ce   :  { %337 = vmax.xlane.f32.xlu1 %v336_v22  ;;  %v538_v24 = vsel %vm335_vm6, %v530_v20, -inf }
 0x3d1   :  { %539 = vmax.xlane.f32.xlu0 %v538_v24 }
 0x3d2   :  { %v2895_v25 = vpop.f32.mrb[6].mxu0 }
 0x3d3   :  { %v740_v26 = vpop.f32.mrb[7].mxu0  ;;  %v746_v27 = vadd.f32 %v2895_v25, %v3713_v11 }
 0x3d4   :  { %v741_v28 = vadd.f32 %v740_v26, %v3715_v12 }
 0x3d5   :  { %542 = vmax.xlane.f32.xlu0 %v541_v29  ;;  %v752_v31 = vsel %vm335_vm6, %v746_v27, -inf }
 0x3d6   :  { %v749_v30 = vsel %vm335_vm6, %v741_v28, -inf }
 0x3d7   :  { %750 = vmax.xlane.f32.xlu1 %v749_v30 }
 0x3d9   :  { %753 = vmax.xlane.f32.xlu0 %v752_v31 }
 0x3e8   :  { %3165 = vrot.lane.b32.xlu1 %v3667_v48, %s3485_s1 }
 0x45a   :  { %v341_v32 = vpop.xlane.xlu0 %340 }
 0x45b   :  { %v343_v33 = vsub.f32 %v332_v14, %v341_v32  ;;  %v338_v36 = vpop.xlane.xlu1 %337 }
 0x45c   :  { %v342_v37 = vsub.f32 %v327_v17, %v338_v36 }
 0x45d   :  { %v346_v41 = vmul.f32 1.442695, %v343_v33 }
 0x45e   :  { %v344_v42 = vmul.f32 1.442695, %v342_v37  ;;  %v540_v44 = vpop.xlane.xlu0 %539 }
 0x45f   :  { %3255 = vpow2.f32 %v346_v41  ;;  %v544_v45 = vsub.f32 %v530_v20, %v540_v44 }
 0x460   :  { %3257 = vpow2.f32 %v344_v42 }
 0x461   :  { %v546_v47 = vmul.f32 1.442695, %v544_v45 }
 0x462   :  { %v543_v49 = vpop.xlane.xlu0 %542 }
 0x463   :  { %3259 = vpow2.f32 %v546_v47  ;;  %v545_v50 = vsub.f32 %v535_v23, %v543_v49 }
 0x464   :  { %v751_v51 = vpop.xlane.xlu1 %750 }
 0x465   :  { %v548_v52 = vmul.f32 1.442695, %v545_v50  ;;  %v755_v7 = vsub.f32 %v741_v28, %v751_v51 }
 0x466   :  { %v754_v53 = vpop.xlane.xlu0 %753 }
 0x467   :  { %3261 = vpow2.f32 %v548_v52  ;;  %v756_v54 = vsub.f32 %v746_v27, %v754_v53  ;;  %v757_v8 = vmul.f32 1.442695, %v755_v7 }
 0x468   :  { %v3166_v56 = vpop.permute.xlu1 %3165 }
 0x469   :  { %v3256_v57 = vpop.eup %3255  ;;  %v759_v58 = vmul.f32 1.442695, %v756_v54  ;;  %v3168_v59 = vunpack.i.h.bf16 %v3166_v56  ;;  %v3167_v60 = vunpack.i.l.bf16 %v3166_v56 }
 0x46a   :  { %v3258_v61 = vpop.eup %3257  ;;  %v351_v62 = vsel %vm335_vm6, %v3256_v57, 0.0 }
 0x46b   :  { %3263 = vpow2.f32 %v759_v58  ;;  %v3051_v63 = vpack.c.bf16 %v3168_v59, %v3167_v60  ;;  %352 = vadd.xlane.f32.xlu0 %v351_v62  ;;  %v348_v0 = vsel %vm335_vm6, %v3258_v61, 0.0 }
 0x46c   :  { %349 = vadd.xlane.f32.xlu1 %v348_v0  ;;  %3265 = vpow2.f32 %v757_v8 }
 0x46d   :  { %v3260_v1 = vpop.eup %3259  ;;  %3052 = vmatprep.subr.bf16.mxu1 %v3051_v63 }
 0x46e   :  { %3054 = vmatpush3.bf16.msra.mxu1 %v3051_v63  ;;  %v550_v2 = vsel %vm335_vm6, %v3260_v1, 0.0 }
 0x470   :  { %551 = vadd.xlane.f32.xlu1 %v550_v2 }
 0x471   :  { %v3262_v3 = vpop.eup %3261 }
 0x472   :  { %v553_v4 = vsel %vm335_vm6, %v3262_v3, 0.0 }
 0x473   :  { %554 = vadd.xlane.f32.xlu0 %v553_v4 }
 0x475   :  { %v3264_v5 = vpop.eup %3263 }
 0x476   :  { %v764_v6 = vsel %vm335_vm6, %v3264_v5, 0.0  ;;  %v3266_v9 = vpop.eup %3265 }
 0x477   :  { %765 = vadd.xlane.f32.xlu0 %v764_v6  ;;  %v761_v10 = vsel %vm335_vm6, %v3266_v9, 0.0 }
 0x481   :  { %3175 = vrot.lane.b32.xlu1 %v3667_v48, %s3499_s12 }
 0x485   :  { %3180 = vrot.lane.b32.xlu1 %v3667_v48, %s3500_s0 }
 0x48d   :  { %3170 = vrot.lane.b32.xlu0 %v3667_v48, %s3501_s10 }
 0x491   :  { %871 = vrot.lane.b32.xlu0 %v3661_v46, %s3502_s13 }
 0x4a9   :  { %762 = vadd.xlane.f32.xlu1 %v761_v10 }
 0x4ba   :  { %869 = vrot.lane.b32.xlu1 %v3659_v43, %s3502_s13 }
 0x4f8   :  { %v353_v13 = vpop.xlane.xlu0 %352 }
 0x4f9   :  { %3267 = vrcp.f32 %v353_v13  ;;  %v350_v14 = vpop.xlane.xlu1 %349 }
 0x4fa   :  { %3269 = vrcp.f32 %v350_v14 }
 0x4fd   :  { %v552_v15 = vpop.xlane.xlu1 %551 }
 0x4fe   :  { %3271 = vrcp.f32 %v552_v15 }
 0x500   :  { %v555_v16 = vpop.xlane.xlu0 %554 }
 0x501   :  { %3273 = vrcp.f32 %v555_v16  ;;  %v3176_v19 = vpop.permute.xlu1 %3175 }
 0x502   :  { %v3178_v24 = vunpack.i.h.bf16 %v3176_v19  ;;  %v3177_v25 = vunpack.i.l.bf16 %v3176_v19 }
 0x503   :  { %v3268_v17 = vpop.eup %3267 }
 0x504   :  { %v3270_v46 = vpop.eup %3269  ;;  %v766_v20 = vpop.xlane.xlu0 %765  ;;  %v357_v22 = vmul.f32 %v3268_v17, %v3256_v57  ;;  %v3071_v32 = vpack.c.bf16 %v3178_v24, %v3177_v25  ;;  %v3231_v25 = vld [vmem:[#allocation9 + $0x10] sm:$0xff]  }
 0x505   :  { %v356_v21 = vmul.f32 %v3270_v46, %v3258_v61  ;;  %v3181_v29 = vpop.permute.xlu1 %3180  ;;  %3275 = vrcp.f32 %v766_v20  ;;  %2918 = vmatpush3.bf16.msra.mxu0 %v3231_v25 }
 0x506   :  { %v3183_v33 = vunpack.i.h.bf16 %v3181_v29  ;;  %v3182_v36 = vunpack.i.l.bf16 %v3181_v29  ;;  %2919 = vmatprep.subr.bf16.mxu0 %v3492_v18 }
 0x507   :  { %2872 = vmatprep.mubr.msk.f32.mxu1 %vm335_vm6, %v356_v21 }
 0x508   :  { %v3272_v23 = vpop.eup %3271  ;;  %2873 = vmatmul.mubr.msk.f32.vlgmr.msra.gmra.mrb[2].mxu1 %vm335_vm6, %v357_v22  ;;  %v3171_v43 = vpop.permute.xlu0 %3170  ;;  %v3075_v41 = vpack.c.bf16 %v3183_v33, %v3182_v36  ;;  %v1085_v36 = vsub.s32 1, %v3647_v38 }
 0x509   :  { %v3173_v26 = vunpack.i.h.bf16 %v3171_v43  ;;  %v3172_v27 = vunpack.i.l.bf16 %v3171_v43  ;;  %v558_v28 = vmul.f32 %v3272_v23, %v3260_v1 }
 0x50b   :  { %v3061_v30 = vpack.c.bf16 %v3173_v26, %v3172_v27  ;;  %2886 = vmatprep.mubr.msk.f32.mxu1 %vm335_vm6, %v558_v28  ;;  %v3274_v31 = vpop.eup %3273  ;;  %v3232_v26 = vld [vmem:[#allocation9 + $0x18] sm:$0xff]  }
 0x50c   :  { %v559_v37 = vmul.f32 %v3274_v31, %v3262_v3  ;;  %v872_v51 = vpop.permute.xlu0 %871  ;;  %2920 = vmatpush3.bf16.msra.mxu0 %v3232_v26 }
 0x50d   :  { %3062 = vmatprep.subr.bf16.mxu1 %v3061_v30  ;;  %2933 = vmatprep.subr.bf16.mxu0 %v3492_v18 }
 0x50e   :  { %3064 = vmatpush3.bf16.msra.mxu1 %v3061_v30 }
 0x50f   :  { %3072 = vmatprep.subr.bf16.mxu1 %v3071_v32  ;;  %v3276_v44 = vpop.eup %3275 }
 0x510   :  { %v770_v49 = vmul.f32 %v3276_v44, %v3264_v5 }
 0x511   :  { %2887 = vmatmul.mubr.msk.f32.vlgmr.msra.gmra.mrb[4].mxu1 %vm335_vm6, %v559_v37  ;;  %v1086_v37 = vrot.slane %v3655_v40, %v1085_v36 }
 0x512   :  { %3074 = vmatpush3.bf16.msra.mxu1 %v3071_v32 }
 0x513   :  { %3077 = vmatprep.subr.msk.bf16.mxu1 %vm3685_vm3, %v3075_v41 }
 0x536   :  { %v763_v42 = vpop.xlane.xlu1 %762 }
 0x537   :  { %3277 = vrcp.f32 %v763_v42 }
 0x53a   :  { %v870_v50 = vpop.permute.xlu1 %869 }
 0x541   :  { %v3278_v45 = vpop.eup %3277 }
 0x542   :  { %v769_v47 = vmul.f32 %v3278_v45, %v3266_v9 }
 0x544   :  { %2900 = vmatprep.mubr.msk.f32.mxu1 %vm335_vm6, %v769_v47 }
 0x545   :  { %2901 = vmatmul.mubr.msk.f32.vlgmr.msra.gmra.mrb[6].mxu1 %vm335_vm6, %v770_v49 }
 0x546   :  { %3080 = vmatpush3.bf16.xpose.msk.msra.mxu1 %vm3685_vm3, %v3075_v41  ;;  %2907 = vmatprep.mubr.msk.f32.mxu1 %vm251_vm2, %v870_v50 }
 0x54d   :  { %2908 = vmatmul.mubr.msk.f32.vlgmr.msra.gmra.mrb[8].mxu1 %vm251_vm2, %v872_v51 }
 0x5db   :  { %v2874_v52 = vpop.f32.mrb[2].mxu1 }
 0x5dc   :  { %446 = vst.msk [vmem:[#allocation2 + $0x8] sm:$0xff] %vm251_vm2, %v2874_v52  ;;  %v436_v53 = vpop.f32.mrb[3].mxu1 }
 0x5dd   :  { %445 = vst.msk [vmem:[#allocation2] sm:$0xff] %vm251_vm2, %v436_v53 }
 0x5e4   :  { %v2888_v54 = vpop.f32.mrb[4].mxu1 }
 0x5e5   :  { %v638_v56 = vpop.f32.mrb[5].mxu1 }
 0x618   :  { %v2902_v57 = vpop.f32.mrb[6].mxu1 }
 0x619   :  { %v849_v58 = vpop.f32.mrb[7].mxu1 }
 0x620   :  { %v2909_v59 = vpop.f32.mrb[8].mxu1 }
 0x621   :  { %v957_v60 = vadd.f32 %v2909_v59, %v3713_v11  ;;  %v951_v61 = vpop.f32.mrb[9].mxu1 }
 0x622   :  { %v952_v62 = vadd.f32 %v951_v61, %v3715_v12 }
 0x623   :  { %v963_v63 = vsel %vm335_vm6, %v957_v60, -inf }
 0x624   :  { %964 = vmax.xlane.f32.xlu0 %v963_v63  ;;  %v960_v0 = vsel %vm335_vm6, %v952_v62, -inf }
 0x625   :  { %961 = vmax.xlane.f32.xlu1 %v960_v0  ;;  %v3233_v0 = vld [vmem:[#allocation9 + $0x20] sm:$0xff]  }
 0x636   :  { %3185 = vrot.lane.b32.xlu1 %v3667_v48, %s3503_s14 }
 0x63a   :  { %651 = vrot.lane.b32.xlu1 %v2888_v54, %s3489_s30 }
 0x63e   :  { %860 = vrot.lane.b32.xlu1 %v849_v58, %s3504_s15 }
 0x642   :  { %862 = vrot.lane.b32.xlu1 %v2902_v57, %s3504_s15 }
 0x6b1   :  { %v965_v1 = vpop.xlane.xlu0 %964 }
 0x6b2   :  { %v967_v2 = vsub.f32 %v957_v60, %v965_v1  ;;  %v962_v3 = vpop.xlane.xlu1 %961 }
 0x6b3   :  { %v966_v4 = vsub.f32 %v952_v62, %v962_v3 }
 0x6b4   :  { %v970_v5 = vmul.f32 1.442695, %v967_v2 }
 0x6b5   :  { %v968_v6 = vmul.f32 1.442695, %v966_v4 }
 0x6b6   :  { %v3186_v7 = vpop.permute.xlu1 %3185 }
 0x6b7   :  { %3279 = vpow2.f32 %v968_v6  ;;  %v3188_v8 = vunpack.i.h.bf16 %v3186_v7  ;;  %v3187_v9 = vunpack.i.l.bf16 %v3186_v7  ;;  %v1173_v7 = vsub.s32 2, %v3647_v38 }
 0x6b8   :  { %3281 = vpow2.f32 %v970_v5 }
 0x6b9   :  { %v3081_v48 = vpack.c.bf16 %v3188_v8, %v3187_v9  ;;  %v1174_v9 = vrot.slane %v3655_v40, %v1173_v7 }
 0x6ba   :  { %v652_v10 = vpop.permute.xlu1 %651 }
 0x6bb   :  { %657 = vst.msk [vmem:[#allocation2 + $0x8] sm:$0xff] %vm655_vm7, %v652_v10  ;;  %3082 = vmatprep.subr.bf16.mxu1 %v3081_v48  ;;  %v1179_v10 = vsub.s32 3, %v3647_v38 }
 0x6bc   :  { %3084 = vmatpush3.bf16.msra.mxu1 %v3081_v48 }
 0x6bd   :  { %2925 = vmatprep.subr.bf16.mxu1 %v3492_v18 }
 0x6be   :  { %v861_v13 = vpop.permute.xlu1 %860 }
 0x6c1   :  { %v3280_v14 = vpop.eup %3279 }
 0x6c2   :  { %v863_v15 = vpop.permute.xlu1 %862  ;;  %v972_v16 = vsel %vm335_vm6, %v3280_v14, 0.0  ;;  %v3282_v17 = vpop.eup %3281 }
 0x6c3   :  { %868 = vst.msk [vmem:[#allocation2 + $0x8] sm:$0xff] %vm866_vm8, %v863_v15  ;;  %973 = vadd.xlane.f32.xlu0 %v972_v16  ;;  %v975_v46 = vsel %vm335_vm6, %v3282_v17, 0.0  ;;  %v1180_v16 = vrot.slane %v3655_v40, %v1179_v10 }
 0x6c7   :  { %976 = vadd.xlane.f32.xlu0 %v975_v46 }
 0x6dd   :  { %649 = vrot.lane.b32.xlu0 %v638_v56, %s3489_s30 }
 0x750   :  { %v974_v19 = vpop.xlane.xlu0 %973 }
 0x751   :  { %3283 = vrcp.f32 %v974_v19 }
 0x754   :  { %v977_v20 = vpop.xlane.xlu0 %976 }
 0x755   :  { %3285 = vrcp.f32 %v977_v20 }
 0x758   :  { %v650_v21 = vpop.permute.xlu0 %649 }
 0x759   :  { %656 = vst.msk [vmem:[#allocation2] sm:$0xff] %vm655_vm7, %v650_v21  ;;  %v3235_v21 = vld [vmem:[#allocation9 + $0x30] sm:$0xff]  }
 0x75a   :  { %867 = vst.msk [vmem:[#allocation2] sm:$0xff] %vm866_vm8, %v861_v13 }
 0x75b   :  { %v3284_v22 = vpop.eup %3283 }
 0x75c   :  { %v980_v23 = vmul.f32 %v3284_v22, %v3280_v14  ;;  %v3236_v22 = vld [vmem:[#allocation9 + $0x38] sm:$0xff]  }
 0x75e   :  { %2914 = vmatprep.mubr.msk.f32.mxu1 %vm335_vm6, %v980_v23  ;;  %v3237_v23 = vld [vmem:[#allocation9 + $0x40] sm:$0xff]  }
 0x75f   :  { %v3286_v24 = vpop.eup %3285 }
 0x760   :  { %v981_v43 = vmul.f32 %v3286_v24, %v3282_v17  ;;  %v3238_v24 = vld [vmem:[#allocation9 + $0x48] sm:$0xff]  }
 0x762   :  { %2915 = vmatmul.mubr.msk.f32.vlgmr.msra.gmra.mrb[10].mxu1 %vm335_vm6, %v981_v43  ;;  %v1186_v43 = vsub.s32 4, %v3647_v38 }
 0x763   :  { %2929 = vmatprep.mubr.msk.bf16.mxu1 %vm3493_vm1, %v3492_v18  ;;  %2926 = vmatpush3.bf16.msra.mxu1 %v3233_v0 }
 0x764   :  { %2927 = vmatprep.subr.bf16.mxu1 %v3492_v18  ;;  %v1187_v25 = vrot.slane %v3655_v40, %v1186_v43 }
 0x835   :  { %v2916_v27 = vpop.f32.mrb[10].mxu1 }
 0x836   :  { %1073 = vrot.lane.b32.xlu1 %v2916_v27, %s3505_s16  ;;  %v1060_v28 = vpop.f32.mrb[11].mxu1 }
 0x837   :  { %1071 = vrot.lane.b32.xlu0 %v1060_v28, %s3505_s16 }
 0x8a8   :  { %v1074_v29 = vpop.permute.xlu1 %1073 }
 0x8a9   :  { %1079 = vst.msk [vmem:[#allocation2 + $0x8] sm:$0xff] %vm1077_vm9, %v1074_v29  ;;  %v1072_v30 = vpop.permute.xlu0 %1071 }
 0x8aa   :  { %1078 = vst.msk [vmem:[#allocation2] sm:$0xff] %vm1077_vm9, %v1072_v30 }
 0x8b0   :  { %v1081_v31 = vld [vmem:[#allocation2 + $0x8] sm:$0xff] }
 0x8b1   :  { %v1080_v32 = vld [vmem:[#allocation2] sm:$0xff] }
 0x8b2   :  { %v1082_v33 = vpack.c.bf16 %v1081_v31, %v1080_v32 }
 0x8b4   :  { %2922 = vmatmul.mubr.msk.bf16.vlgmr.msra.gmra.mrb[8].mxu0 %vm102_vm0, %v1082_v33 }
 0x8b5   :  { %2941 = vmatprep.mubr.msk.bf16.mxu0 %vm3493_vm1, %v3492_v18  ;;  %2934 = vmatpush3.bf16.msra.mxu0 %v3235_v21  ;;  %v3239_v21 = vld [vmem:[#allocation9 + $0x50] sm:$0xff]  }
 0x8b6   :  { %2935 = vmatprep.subr.bf16.mxu0 %v3492_v18 }
 0x8b9   :  { %2936 = vmatpush3.bf16.msra.mxu0 %v3236_v22 }
 0x8ba   :  { %2937 = vmatprep.subr.bf16.mxu0 %v3492_v18 }
 0x8bd   :  { %2938 = vmatpush3.bf16.msra.mxu0 %v3237_v23 }
 0x8be   :  { %2939 = vmatprep.subr.bf16.mxu0 %v3492_v18 }
 0x8c1   :  { %2940 = vmatpush3.bf16.msra.mxu0 %v3238_v24 }
 0x987   :  { %v1136_v41 = vpop.f32.mrb[8].mxu0 }
 0x988   :  { %v1137_v42 = vadd.f32 %v1136_v41, %v1086_v37  ;;  %v2923_v44 = vpop.f32.mrb[9].mxu0 }
 0x989   :  { %v1139_v45 = vpop.f32.mrb[10].mxu0 }
 0x98a   :  { %v1140_v47 = vadd.f32 %v1139_v45, %v1086_v37  ;;  %v2924_v49 = vpop.f32.mrb[11].mxu0  ;;  %v1143_v50 = vadd.f32 %v1137_v42, %v3640_v34 }
 0x98c   :  { %v1145_v51 = vsel %vm102_vm0, %v1143_v50, 0.0  ;;  %v1144_v52 = vadd.f32 %v1140_v47, %v3642_v35  ;;  %v3234_v35 = vld [vmem:[#allocation9 + $0x28] sm:$0xff]  }
 0x98d   :  { %1146 = vadd.xlane.f32.xlu0 %v1145_v51  ;;  %2928 = vmatpush3.bf16.msra.mxu1 %v3234_v35 }
 0x98e   :  { %v1148_v53 = vsel %vm102_vm0, %v1144_v52, 0.0  ;;  %2945 = vmatprep.subr.bf16.mxu1 %v3492_v18 }
 0x98f   :  { %1149 = vadd.xlane.f32.xlu1 %v1148_v53 }
 0xa1a   :  { %v1147_v54 = vpop.xlane.xlu0 %1146 }
 0xa1b   :  { %v1151_v56 = vmul.f32 0.03125, %v1147_v54 }
 0xa1c   :  { %v1150_v57 = vpop.xlane.xlu1 %1149 }
 0xa1d   :  { %v1153_v58 = vsub.f32 %v1143_v50, %v1151_v56  ;;  %v1152_v59 = vmul.f32 0.03125, %v1150_v57 }
 0xa1f   :  { %v1154_v60 = vsub.f32 %v1144_v52, %v1152_v59  ;;  %v1155_v61 = vmul.f32 %v1153_v58, %v1153_v58 }
 0xa21   :  { %v1157_v62 = vsel %vm102_vm0, %v1155_v61, 0.0  ;;  %v1156_v63 = vmul.f32 %v1154_v60, %v1154_v60  ;;  %v1265_v61 = vsub.s32 5, %v3647_v38 }
 0xa22   :  { %1158 = vadd.xlane.f32.xlu0 %v1157_v62 }
 0xa23   :  { %v1160_v34 = vsel %vm102_vm0, %v1156_v63, 0.0  ;;  %v1266_v62 = vrot.slane %v3655_v40, %v1265_v61 }
 0xa26   :  { %1161 = vadd.xlane.f32.xlu0 %v1160_v34 }
 0xaaf   :  { %v1159_v1 = vpop.xlane.xlu0 %1158 }
 0xab0   :  { %v1163_v2 = vmul.f32 0.03125, %v1159_v1 }
 0xab2   :  { %v1165_v3 = vadd.f32 1e-12, %v1163_v2 }
 0xab3   :  { %v1162_v4 = vpop.xlane.xlu0 %1161 }
 0xab4   :  { %3287 = vrsqrt.f32 %v1165_v3  ;;  %v1164_v5 = vmul.f32 0.03125, %v1162_v4 }
 0xab6   :  { %v1166_v6 = vadd.f32 1e-12, %v1164_v5 }
 0xab8   :  { %3289 = vrsqrt.f32 %v1166_v6 }
 0xabe   :  { %v3288_v8 = vpop.eup %3287 }
 0xabf   :  { %v1169_v48 = vmul.f32 %v3288_v8, %v1153_v58 }
 0xac1   :  { %v1175_v14 = vmul.f32 %v1174_v9, %v1169_v48 }
 0xac2   :  { %v3290_v13 = vpop.eup %3289 }
 0xac3   :  { %v1170_v15 = vmul.f32 %v3290_v13, %v1154_v60  ;;  %v1181_v46 = vadd.f32 %v1180_v16, %v1175_v14 }
 0xac5   :  { %v1176_v17 = vmul.f32 %v1174_v9, %v1170_v15 }
 0xac7   :  { %v1182_v19 = vadd.f32 %v1180_v16, %v1176_v17 }
 0xac9   :  { %v1183_v20 = vpack.c.bf16 %v1182_v19, %v1181_v46 }
 0xacb   :  { %2930 = vmatmul.mubr.msk.bf16.vlgmr.msra.gmra.mrb[12].mxu1 %vm102_vm0, %v1183_v20 }
 0xacc   :  { %2949 = vmatprep.mubr.msk.bf16.mxu1 %vm3493_vm1, %v3492_v18  ;;  %2946 = vmatpush3.bf16.msra.mxu1 %v3239_v21 }
 0xacd   :  { %2947 = vmatprep.subr.bf16.mxu1 %v3492_v18 }
 0xb9e   :  { %v1237_v26 = vpop.f32.mrb[12].mxu1 }
 0xb9f   :  { %v1238_v27 = vadd.f32 %v1237_v26, %v1187_v25  ;;  %v2931_v28 = vpop.f32.mrb[13].mxu1 }
 0xba0   :  { %v1240_v29 = vpop.f32.mrb[14].mxu1  ;;  %v1366_v28 = vsub.s32 6, %v3647_v38 }
 0xba1   :  { %v1244_v30 = vmul.f32 %v1238_v27, %v1238_v27  ;;  %v1241_v31 = vadd.f32 %v1240_v29, %v1187_v25  ;;  %v2932_v32 = vpop.f32.mrb[15].mxu1 }
 0xba2   :  { %v1367_v29 = vrot.slane %v3655_v40, %v1366_v28 }
 0xba3   :  { %v1246_v33 = vmul.f32 %v1244_v30, %v1238_v27  ;;  %v1245_v37 = vmul.f32 %v1241_v31, %v1241_v31  ;;  %v1372_v30 = vsub.s32 7, %v3647_v38 }
 0xba5   :  { %v1248_v41 = vmul.f32 0.044715, %v1246_v33  ;;  %v1247_v42 = vmul.f32 %v1245_v37, %v1241_v31 }
 0xba7   :  { %v1250_v44 = vadd.f32 %v1248_v41, %v1238_v27  ;;  %v1249_v45 = vmul.f32 0.044715, %v1247_v42  ;;  %v1373_v42 = vrot.slane %v3655_v40, %v1372_v30 }
 0xba9   :  { %v1252_v47 = vmul.f32 0.7978846, %v1250_v44  ;;  %v1251_v49 = vadd.f32 %v1249_v45, %v1241_v31 }
 0xbab   :  { %3291 = vtanh.f32 %v1252_v47  ;;  %v1253_v50 = vmul.f32 0.7978846, %v1251_v49 }
 0xbad   :  { %3293 = vtanh.f32 %v1253_v50  ;;  %v3849_v50 = vld [vmem:[%s4034_s5 + $0x8] sm:$0xff] }
 0xbb5   :  { %v3292_v51 = vpop.eup %3291 }
 0xbb6   :  { %v1256_v52 = vadd.f32 1.0, %v3292_v51  ;;  %v1403_v51 = vrot.slane %v3849_v50, %v3650_v39 }
 0xbb7   :  { %v3294_v53 = vpop.eup %3293 }
 0xbb8   :  { %v1258_v54 = vmul.f32 0.5, %v1256_v52  ;;  %v1257_v56 = vadd.f32 1.0, %v3294_v53 }
 0xbba   :  { %v1259_v57 = vmul.f32 0.5, %v1257_v56  ;;  %v1260_v58 = vmul.f32 %v1258_v54, %v1238_v27 }
 0xbbc   :  { %v1261_v59 = vmul.f32 %v1259_v57, %v1241_v31 }
 0xbbe   :  { %v1262_v60 = vpack.c.bf16 %v1261_v59, %v1260_v58 }
 0xbc0   :  { %2942 = vmatmul.mubr.msk.bf16.vlgmr.msra.gmra.mrb[12].mxu0 %vm1291_vm10, %v1262_v60 }
 0xc93   :  { %v1329_v63 = vpop.f32.mrb[12].mxu0 }
 0xc94   :  { %v1330_v34 = vadd.f32 %v1329_v63, %v1266_v62  ;;  %v2943_v0 = vpop.f32.mrb[13].mxu0 }
 0xc95   :  { %v1332_v35 = vpop.f32.mrb[14].mxu0 }
 0xc96   :  { %v1333_v1 = vadd.f32 %v1332_v35, %v1266_v62  ;;  %v2944_v2 = vpop.f32.mrb[15].mxu0  ;;  %v1336_v3 = vadd.f32 %v1330_v34, %v1181_v46 }
 0xc98   :  { %v1338_v4 = vsel %vm102_vm0, %v1336_v3, 0.0  ;;  %v1337_v5 = vadd.f32 %v1333_v1, %v1182_v19  ;;  %v3240_v19 = vld [vmem:[#allocation9 + $0x58] sm:$0xff]  }
 0xc99   :  { %1339 = vadd.xlane.f32.xlu0 %v1338_v4  ;;  %2948 = vmatpush3.bf16.msra.mxu1 %v3240_v19 }
 0xc9a   :  { %v1341_v6 = vsel %vm102_vm0, %v1337_v5, 0.0 }
 0xc9b   :  { %1342 = vadd.xlane.f32.xlu1 %v1341_v6 }
 0xd26   :  { %v1340_v8 = vpop.xlane.xlu0 %1339 }
 0xd27   :  { %v1344_v9 = vmul.f32 0.03125, %v1340_v8 }
 0xd28   :  { %v1343_v48 = vpop.xlane.xlu1 %1342 }
 0xd29   :  { %v1346_v13 = vsub.f32 %v1336_v3, %v1344_v9  ;;  %v1345_v14 = vmul.f32 0.03125, %v1343_v48 }
 0xd2b   :  { %v1347_v15 = vsub.f32 %v1337_v5, %v1345_v14  ;;  %v1348_v16 = vmul.f32 %v1346_v13, %v1346_v13 }
 0xd2d   :  { %v1350_v17 = vsel %vm102_vm0, %v1348_v16, 0.0  ;;  %v1349_v20 = vmul.f32 %v1347_v15, %v1347_v15 }
 0xd2e   :  { %1351 = vadd.xlane.f32.xlu0 %v1350_v17 }
 0xd2f   :  { %v1353_v46 = vsel %vm102_vm0, %v1349_v20, 0.0 }
 0xd30   :  { %1354 = vadd.xlane.f32.xlu1 %v1353_v46 }
 0xdbb   :  { %v1352_v22 = vpop.xlane.xlu0 %1351 }
 0xdbc   :  { %v1356_v23 = vmul.f32 0.03125, %v1352_v22 }
 0xdbd   :  { %v1355_v24 = vpop.xlane.xlu1 %1354 }
 0xdbe   :  { %v1358_v25 = vadd.f32 1e-12, %v1356_v23  ;;  %v1357_v26 = vmul.f32 0.03125, %v1355_v24 }
 0xdc0   :  { %3295 = vrsqrt.f32 %v1358_v25  ;;  %v1359_v27 = vadd.f32 1e-12, %v1357_v26 }
 0xdc2   :  { %3297 = vrsqrt.f32 %v1359_v27 }
 0xdca   :  { %v3296_v31 = vpop.eup %3295 }
 0xdcb   :  { %v1362_v32 = vmul.f32 %v3296_v31, %v1346_v13 }
 0xdcc   :  { %v3298_v33 = vpop.eup %3297 }
 0xdcd   :  { %v1368_v37 = vmul.f32 %v1367_v29, %v1362_v32  ;;  %v1363_v41 = vmul.f32 %v3298_v33, %v1347_v15 }
 0xdcf   :  { %v1369_v44 = vmul.f32 %v1367_v29, %v1363_v41  ;;  %v3839_v45 = vadd.f32 %v1373_v42, %v1368_v37 }
 0xdd1   :  { %v3841_v47 = vadd.f32 %v1373_v42, %v1369_v44 }
 0xdd3   :  { %v1399_v49 = vpack.c.bf16 %v3841_v47, %v3839_v45 }
 0xdd5   :  { %2950 = vmatmul.mubr.msk.bf16.vlgmr.msra.gmra.mrb[16].mxu1 %vm102_vm0, %v1399_v49 }
 0xea8   :  { %v1453_v52 = vpop.f32.mrb[16].mxu1 }
 0xea9   :  { %v3853_v40 = vadd.f32 %v1453_v52, %v1403_v51  ;;  %v2951_v53 = vpop.f32.mrb[17].mxu1 }
 0xeaa   :  { %v1456_v54 = vpop.f32.mrb[18].mxu1 }
 0xeab   :  { %v3855_v56 = vadd.f32 %v1456_v54, %v1403_v51  ;;  %v2952_v57 = vpop.f32.mrb[19].mxu1  ;;  %2957 = vmatprep.mubr.msk.f32.mxu1 %vm251_vm2, %v3853_v40 }
 0xead   :  { %v3861_v58 = vpack.i.bf16 %v3855_v56, %v3853_v40 }
 0xeaf   :  { %3195 = vrot.lane.b32.xlu1 %v3861_v58, %s3494_s3  ;;  %3190 = vrot.lane.b32.xlu0 %v3861_v58, %s3495_s28 }
 0xeb3   :  { %1660 = vrot.lane.b32.xlu1 %v3853_v40, %s3496_s29  ;;  %1662 = vrot.lane.b32.xlu0 %v3855_v56, %s3496_s29 }
 0xeb7   :  { %3200 = vrot.lane.b32.xlu1 %v3861_v58, %s3497_s9  ;;  %1872 = vrot.lane.b32.xlu0 %v3855_v56, %s3498_s11 }
 0xebb   :  { %1870 = vrot.lane.b32.xlu1 %v3853_v40, %s3498_s11 }
 0xf21   :  { %v3196_v39 = vpop.permute.xlu1 %3195  ;;  %v3191_v59 = vpop.permute.xlu0 %3190 }
 0xf22   :  { %v3198_v60 = vunpack.i.h.bf16 %v3196_v39  ;;  %v3197_v62 = vunpack.i.l.bf16 %v3196_v39  ;;  %v3193_v63 = vunpack.i.h.bf16 %v3191_v59  ;;  %v3192_v34 = vunpack.i.l.bf16 %v3191_v59 }
 0xf24   :  { %v3095_v0 = vpack.c.bf16 %v3198_v60, %v3197_v62  ;;  %v3085_v35 = vpack.c.bf16 %v3193_v63, %v3192_v34 }
 0xf25   :  { %v1661_v1 = vpop.permute.xlu1 %1660  ;;  %v1663_v8 = vpop.permute.xlu0 %1662 }
 0xf26   :  { %3087 = vmatprep.subr.msk.bf16.mxu1 %vm3685_vm3, %v3085_v35  ;;  %3097 = vmatprep.subr.msk.bf16.mxu0 %vm3685_vm3, %v3095_v0 }
 0xf27   :  { %2971 = vmatprep.mubr.msk.f32.mxu0 %vm251_vm2, %v1661_v1  ;;  %3090 = vmatpush3.bf16.xpose.msk.msra.mxu1 %vm3685_vm3, %v3085_v35 }
 0xf28   :  { %3100 = vmatpush3.bf16.xpose.msk.msra.mxu0 %vm3685_vm3, %v3095_v0 }
 0xf29   :  { %v3201_v2 = vpop.permute.xlu1 %3200  ;;  %v1873_v9 = vpop.permute.xlu0 %1872 }
 0xf2a   :  { %v3203_v3 = vunpack.i.h.bf16 %v3201_v2  ;;  %v3202_v4 = vunpack.i.l.bf16 %v3201_v2 }
 0xf2c   :  { %v3105_v5 = vpack.c.bf16 %v3203_v3, %v3202_v4 }
 0xf2d   :  { %v1871_v6 = vpop.permute.xlu1 %1870 }
 0xf2e   :  { %2958 = vmatmul.mubr.msk.f32.vlgmr.msra.gmra.mrb[20].mxu1 %vm251_vm2, %v3855_v56  ;;  %3107 = vmatprep.subr.msk.bf16.mxu0 %vm3685_vm3, %v3105_v5 }
 0xf2f   :  { %2972 = vmatmul.mubr.msk.f32.vlgmr.msra.gmra.mrb[16].mxu0 %vm251_vm2, %v1663_v8 }
 0xf30   :  { %3110 = vmatpush3.bf16.xpose.msk.msra.mxu0 %vm3685_vm3, %v3105_v5  ;;  %2985 = vmatprep.mubr.msk.f32.mxu0 %vm251_vm2, %v1871_v6 }
 0xf37   :  { %2986 = vmatmul.mubr.msk.f32.vlgmr.msra.gmra.mrb[18].mxu0 %vm251_vm2, %v1873_v9 }
0x1001   :  { %v2959_v48 = vpop.f32.mrb[20].mxu1 }
0x1002   :  { %v1546_v13 = vadd.f32 %v2959_v48, %v3713_v11  ;;  %v2973_v14 = vpop.f32.mrb[16].mxu0  ;;  %v1540_v15 = vpop.f32.mrb[21].mxu1 }
0x1003   :  { %v1541_v16 = vadd.f32 %v1540_v15, %v3715_v12  ;;  %v1742_v17 = vpop.f32.mrb[17].mxu0  ;;  %v1748_v19 = vadd.f32 %v2973_v14, %v3713_v11 }
0x1004   :  { %v1743_v20 = vadd.f32 %v1742_v17, %v3715_v12  ;;  %v1552_v46 = vsel %vm335_vm6, %v1546_v13, -inf }
0x1005   :  { %1553 = vmax.xlane.f32.xlu0 %v1552_v46  ;;  %v1549_v21 = vsel %vm335_vm6, %v1541_v16, -inf  ;;  %v1754_v27 = vsel %vm335_vm6, %v1748_v19, -inf }
0x1006   :  { %1550 = vmax.xlane.f32.xlu1 %v1549_v21  ;;  %v1751_v22 = vsel %vm335_vm6, %v1743_v20, -inf }
0x1009   :  { %1752 = vmax.xlane.f32.xlu0 %v1751_v22 }
0x100a   :  { %v2987_v23 = vpop.f32.mrb[18].mxu0 }
0x100b   :  { %v1952_v24 = vpop.f32.mrb[19].mxu0  ;;  %v1958_v25 = vadd.f32 %v2987_v23, %v3713_v11 }
0x100c   :  { %v1953_v26 = vadd.f32 %v1952_v24, %v3715_v12 }
0x100d   :  { %1755 = vmax.xlane.f32.xlu0 %v1754_v27  ;;  %v1964_v31 = vsel %vm335_vm6, %v1958_v25, -inf }
0x100e   :  { %v1961_v29 = vsel %vm335_vm6, %v1953_v26, -inf }
0x100f   :  { %1962 = vmax.xlane.f32.xlu1 %v1961_v29 }
0x1011   :  { %1965 = vmax.xlane.f32.xlu0 %v1964_v31 }
0x1020   :  { %3205 = vrot.lane.b32.xlu1 %v3861_v58, %s3485_s1 }
0x1092   :  { %v1554_v32 = vpop.xlane.xlu0 %1553 }
0x1093   :  { %v1556_v33 = vsub.f32 %v1546_v13, %v1554_v32  ;;  %v1551_v37 = vpop.xlane.xlu1 %1550 }
0x1094   :  { %v1555_v41 = vsub.f32 %v1541_v16, %v1551_v37 }
0x1095   :  { %v1559_v42 = vmul.f32 1.442695, %v1556_v33 }
0x1096   :  { %v1557_v44 = vmul.f32 1.442695, %v1555_v41  ;;  %v1753_v49 = vpop.xlane.xlu0 %1752 }
0x1097   :  { %3299 = vpow2.f32 %v1559_v42  ;;  %v1757_v51 = vsub.f32 %v1743_v20, %v1753_v49 }
0x1098   :  { %3301 = vpow2.f32 %v1557_v44 }
0x1099   :  { %v1759_v52 = vmul.f32 1.442695, %v1757_v51 }
0x109a   :  { %v1756_v53 = vpop.xlane.xlu0 %1755 }
0x109b   :  { %3303 = vpow2.f32 %v1759_v52  ;;  %v1758_v54 = vsub.f32 %v1748_v19, %v1756_v53 }
0x109c   :  { %v1963_v57 = vpop.xlane.xlu1 %1962 }
0x109d   :  { %v1761_v39 = vmul.f32 1.442695, %v1758_v54  ;;  %v1967_v14 = vsub.f32 %v1953_v26, %v1963_v57 }
0x109e   :  { %v1966_v59 = vpop.xlane.xlu0 %1965 }
0x109f   :  { %3305 = vpow2.f32 %v1761_v39  ;;  %v1968_v60 = vsub.f32 %v1958_v25, %v1966_v59  ;;  %v1969_v15 = vmul.f32 1.442695, %v1967_v14 }
0x10a0   :  { %v3206_v62 = vpop.permute.xlu1 %3205 }
0x10a1   :  { %v3300_v63 = vpop.eup %3299  ;;  %v1971_v34 = vmul.f32 1.442695, %v1968_v60  ;;  %v3208_v0 = vunpack.i.h.bf16 %v3206_v62  ;;  %v3207_v35 = vunpack.i.l.bf16 %v3206_v62 }
0x10a2   :  { %v3302_v1 = vpop.eup %3301  ;;  %v1564_v2 = vsel %vm335_vm6, %v3300_v63, 0.0 }
0x10a3   :  { %3307 = vpow2.f32 %v1971_v34  ;;  %v3091_v3 = vpack.c.bf16 %v3208_v0, %v3207_v35  ;;  %1565 = vadd.xlane.f32.xlu0 %v1564_v2  ;;  %v1561_v4 = vsel %vm335_vm6, %v3302_v1, 0.0 }
0x10a4   :  { %1562 = vadd.xlane.f32.xlu1 %v1561_v4  ;;  %3309 = vpow2.f32 %v1969_v15 }
0x10a5   :  { %v3304_v5 = vpop.eup %3303  ;;  %3092 = vmatprep.subr.bf16.mxu1 %v3091_v3 }
0x10a6   :  { %3094 = vmatpush3.bf16.msra.mxu1 %v3091_v3  ;;  %v1763_v6 = vsel %vm335_vm6, %v3304_v5, 0.0 }
0x10a8   :  { %1764 = vadd.xlane.f32.xlu1 %v1763_v6 }
0x10a9   :  { %v3306_v8 = vpop.eup %3305 }
0x10aa   :  { %v1766_v9 = vsel %vm335_vm6, %v3306_v8, 0.0 }
0x10ab   :  { %1767 = vadd.xlane.f32.xlu0 %v1766_v9 }
0x10ad   :  { %v3308_v48 = vpop.eup %3307 }
0x10ae   :  { %v1976_v13 = vsel %vm335_vm6, %v3308_v48, 0.0  ;;  %v3310_v16 = vpop.eup %3309 }
0x10af   :  { %1977 = vadd.xlane.f32.xlu0 %v1976_v13  ;;  %v1973_v17 = vsel %vm335_vm6, %v3310_v16, 0.0 }
0x10b9   :  { %3215 = vrot.lane.b32.xlu1 %v3861_v58, %s3499_s12 }
0x10bd   :  { %3220 = vrot.lane.b32.xlu1 %v3861_v58, %s3500_s0 }
0x10c5   :  { %3210 = vrot.lane.b32.xlu0 %v3861_v58, %s3501_s10 }
0x10c9   :  { %2082 = vrot.lane.b32.xlu0 %v3855_v56, %s3502_s13 }
0x10e1   :  { %1974 = vadd.xlane.f32.xlu1 %v1973_v17 }
0x10f2   :  { %2080 = vrot.lane.b32.xlu1 %v3853_v40, %s3502_s13 }
0x1130   :  { %v1566_v20 = vpop.xlane.xlu0 %1565 }
0x1131   :  { %3311 = vrcp.f32 %v1566_v20  ;;  %v1563_v46 = vpop.xlane.xlu1 %1562 }
0x1132   :  { %3313 = vrcp.f32 %v1563_v46 }
0x1135   :  { %v1765_v21 = vpop.xlane.xlu1 %1764 }
0x1136   :  { %3315 = vrcp.f32 %v1765_v21 }
0x1138   :  { %v1768_v19 = vpop.xlane.xlu0 %1767 }
0x1139   :  { %3317 = vrcp.f32 %v1768_v19  ;;  %v3216_v23 = vpop.permute.xlu1 %3215 }
0x113a   :  { %v3218_v29 = vunpack.i.h.bf16 %v3216_v23  ;;  %v3217_v31 = vunpack.i.l.bf16 %v3216_v23 }
0x113b   :  { %v3312_v22 = vpop.eup %3311 }
0x113c   :  { %v3314_v56 = vpop.eup %3313  ;;  %v1978_v24 = vpop.xlane.xlu0 %1977  ;;  %v1570_v26 = vmul.f32 %v3312_v22, %v3300_v63  ;;  %v3111_v49 = vpack.c.bf16 %v3218_v29, %v3217_v31 }
0x113d   :  { %v1569_v25 = vmul.f32 %v3314_v56, %v3302_v1  ;;  %v3221_v41 = vpop.permute.xlu1 %3220  ;;  %3319 = vrcp.f32 %v1978_v24 }
0x113e   :  { %v3223_v51 = vunpack.i.h.bf16 %v3221_v41  ;;  %v3222_v52 = vunpack.i.l.bf16 %v3221_v41  ;;  %v3242_v41 = vld [vmem:[#allocation9 + $0x68] sm:$0xff]  }
0x113f   :  { %2964 = vmatprep.mubr.msk.f32.mxu1 %vm335_vm6, %v1569_v25 }
0x1140   :  { %v3316_v27 = vpop.eup %3315  ;;  %2965 = vmatmul.mubr.msk.f32.vlgmr.msra.gmra.mrb[22].mxu1 %vm335_vm6, %v1570_v26  ;;  %v3211_v40 = vpop.permute.xlu0 %3210  ;;  %v3115_v54 = vpack.c.bf16 %v3223_v51, %v3222_v52 }
0x1141   :  { %v3213_v32 = vunpack.i.h.bf16 %v3211_v40  ;;  %v3212_v33 = vunpack.i.l.bf16 %v3211_v40  ;;  %v1771_v37 = vmul.f32 %v3316_v27, %v3304_v5 }
0x1143   :  { %v3101_v42 = vpack.c.bf16 %v3213_v32, %v3212_v33  ;;  %2978 = vmatprep.mubr.msk.f32.mxu1 %vm335_vm6, %v1771_v37  ;;  %v3318_v44 = vpop.eup %3317  ;;  %v3241_v37 = vld [vmem:[#allocation9 + $0x60] sm:$0xff]  }
0x1144   :  { %v1772_v53 = vmul.f32 %v3318_v44, %v3306_v8  ;;  %v2083_v34 = vpop.permute.xlu0 %2082 }
0x1145   :  { %3102 = vmatprep.subr.bf16.mxu1 %v3101_v42 }
0x1146   :  { %3104 = vmatpush3.bf16.msra.mxu1 %v3101_v42 }
0x1147   :  { %3112 = vmatprep.subr.bf16.mxu1 %v3111_v49  ;;  %v3320_v39 = vpop.eup %3319 }
0x1148   :  { %v1982_v62 = vmul.f32 %v3320_v39, %v3308_v48 }
0x1149   :  { %2979 = vmatmul.mubr.msk.f32.vlgmr.msra.gmra.mrb[24].mxu1 %vm335_vm6, %v1772_v53 }
0x114a   :  { %3114 = vmatpush3.bf16.msra.mxu1 %v3111_v49 }
0x114b   :  { %3117 = vmatprep.subr.msk.bf16.mxu1 %vm3685_vm3, %v3115_v54 }
0x116e   :  { %v1975_v57 = vpop.xlane.xlu1 %1974 }
0x116f   :  { %3321 = vrcp.f32 %v1975_v57  ;;  %v2296_v57 = vrot.slane %v3849_v50, %v1085_v36 }
0x1172   :  { %v2081_v63 = vpop.permute.xlu1 %2080 }
0x1179   :  { %v3322_v59 = vpop.eup %3321 }
0x117a   :  { %v1981_v60 = vmul.f32 %v3322_v59, %v3310_v16 }
0x117c   :  { %2992 = vmatprep.mubr.msk.f32.mxu1 %vm335_vm6, %v1981_v60 }
0x117d   :  { %2993 = vmatmul.mubr.msk.f32.vlgmr.msra.gmra.mrb[26].mxu1 %vm335_vm6, %v1982_v62 }
0x117e   :  { %3120 = vmatpush3.bf16.xpose.msk.msra.mxu1 %vm3685_vm3, %v3115_v54  ;;  %2999 = vmatprep.mubr.msk.f32.mxu1 %vm251_vm2, %v2081_v63 }
0x117f   :  { %3017 = vmatprep.subr.bf16.mxu1 %v3492_v18 }
0x1185   :  { %3000 = vmatmul.mubr.msk.f32.vlgmr.msra.gmra.mrb[28].mxu1 %vm251_vm2, %v2083_v34 }
0x1186   :  { %3021 = vmatprep.mubr.msk.bf16.mxu1 %vm3493_vm1, %v3492_v18 }
0x1213   :  { %v2966_v0 = vpop.f32.mrb[22].mxu1 }
0x1214   :  { %1659 = vst.msk [vmem:[#allocation2 + $0x8] sm:$0xff] %vm251_vm2, %v2966_v0  ;;  %v1649_v35 = vpop.f32.mrb[23].mxu1 }
0x1215   :  { %1658 = vst.msk [vmem:[#allocation2] sm:$0xff] %vm251_vm2, %v1649_v35 }
0x121c   :  { %v2980_v1 = vpop.f32.mrb[24].mxu1 }
0x121d   :  { %v1851_v2 = vpop.f32.mrb[25].mxu1 }
0x1250   :  { %v2994_v55 = vpop.f32.mrb[26].mxu1 }
0x1251   :  { %v2061_v3 = vpop.f32.mrb[27].mxu1 }
0x1258   :  { %v3001_v4 = vpop.f32.mrb[28].mxu1 }
0x1259   :  { %v2168_v5 = vadd.f32 %v3001_v4, %v3713_v11  ;;  %v2162_v6 = vpop.f32.mrb[29].mxu1 }
0x125a   :  { %v2163_v8 = vadd.f32 %v2162_v6, %v3715_v12 }
0x125b   :  { %v2174_v9 = vsel %vm335_vm6, %v2168_v5, -inf }
0x125c   :  { %2175 = vmax.xlane.f32.xlu0 %v2174_v9  ;;  %v2171_v48 = vsel %vm335_vm6, %v2163_v8, -inf }
0x125d   :  { %2172 = vmax.xlane.f32.xlu1 %v2171_v48 }
0x126e   :  { %3225 = vrot.lane.b32.xlu1 %v3861_v58, %s3503_s14 }
0x1272   :  { %1864 = vrot.lane.b32.xlu1 %v2980_v1, %s3489_s30 }
0x1276   :  { %2072 = vrot.lane.b32.xlu1 %v2061_v3, %s3504_s15 }
0x127a   :  { %2074 = vrot.lane.b32.xlu1 %v2994_v55, %s3504_s15 }
0x12e9   :  { %v2176_v13 = vpop.xlane.xlu0 %2175 }
0x12ea   :  { %v2178_v11 = vsub.f32 %v2168_v5, %v2176_v13  ;;  %v2173_v14 = vpop.xlane.xlu1 %2172  ;;  %v3243_v13 = vld [vmem:[#allocation9 + $0x70] sm:$0xff]  }
0x12eb   :  { %v2177_v15 = vsub.f32 %v2163_v8, %v2173_v14  ;;  %3018 = vmatpush3.bf16.msra.mxu1 %v3243_v13 }
0x12ec   :  { %v2181_v12 = vmul.f32 1.442695, %v2178_v11  ;;  %3019 = vmatprep.subr.bf16.mxu1 %v3492_v18 }
0x12ed   :  { %v2179_v16 = vmul.f32 1.442695, %v2177_v15 }
0x12ee   :  { %v3226_v17 = vpop.permute.xlu1 %3225 }
0x12ef   :  { %3323 = vpow2.f32 %v2179_v16  ;;  %v3228_v20 = vunpack.i.h.bf16 %v3226_v17  ;;  %v3227_v46 = vunpack.i.l.bf16 %v3226_v17 }
0x12f0   :  { %3325 = vpow2.f32 %v2181_v12 }
0x12f1   :  { %v3121_v21 = vpack.c.bf16 %v3228_v20, %v3227_v46  ;;  %v2384_v46 = vrot.slane %v3849_v50, %v1173_v7  ;;  %v3246_v7 = vld [vmem:[#allocation9 + $0x88] sm:$0xff]  }
0x12f2   :  { %v1865_v19 = vpop.permute.xlu1 %1864 }
0x12f3   :  { %1869 = vst.msk [vmem:[#allocation2 + $0x8] sm:$0xff] %vm655_vm7, %v1865_v19  ;;  %3122 = vmatprep.subr.bf16.mxu0 %v3121_v21 }
0x12f4   :  { %3124 = vmatpush3.bf16.msra.mxu0 %v3121_v21 }
0x12f5   :  { %3009 = vmatprep.subr.bf16.mxu0 %v3492_v18 }
0x12f6   :  { %v2073_v58 = vpop.permute.xlu1 %2072 }
0x12f9   :  { %v3324_v22 = vpop.eup %3323 }
0x12fa   :  { %v2075_v56 = vpop.permute.xlu1 %2074  ;;  %v2183_v23 = vsel %vm335_vm6, %v3324_v22, 0.0  ;;  %v3326_v24 = vpop.eup %3325 }
0x12fb   :  { %2079 = vst.msk [vmem:[#allocation2 + $0x8] sm:$0xff] %vm866_vm8, %v2075_v56  ;;  %2184 = vadd.xlane.f32.xlu0 %v2183_v23  ;;  %v2186_v25 = vsel %vm335_vm6, %v3326_v24, 0.0  ;;  %v2390_v56 = vrot.slane %v3849_v50, %v1179_v10  ;;  %v3248_v10 = vld [vmem:[#allocation9 + $0x98] sm:$0xff]  }
0x12ff   :  { %2187 = vadd.xlane.f32.xlu0 %v2186_v25 }
0x1315   :  { %1862 = vrot.lane.b32.xlu0 %v1851_v2, %s3489_s30  ;;  %s3506_s30 = smov [#allocation12]  }
0x1316   :  { %s2664_s4 = sshll.u32 %s3506_s30, 4  ;;  %s2665_s4 = int_to_ptr.vmem [resolvable:$true] %s2664_s4 }
0x1317   :  { %s3453_s19 = scalar_lea.vmem %s2665_s4, 32  ;;  %p3458_p13 = scmp.lt.s32.totalorder %s2665_s4, %s2665_s4 }
0x1318   :  { %p3454_p12 = scmp.ne.s32.totalorder %s2665_s4, %s3453_s19  ;;  %p3459_p0 = scmp.lt.s32.totalorder %s3453_s19, %s3453_s19 }
0x131a   :  { %p3460_p1 = por %p3459_p0, %p3458_p13 }
0x131c   :  { %p3461_p2 = pnand %p3460_p1, %p3454_p12 }
0x1388   :  { %v2185_v26 = vpop.xlane.xlu0 %2184 }
0x1389   :  { %3327 = vrcp.f32 %v2185_v26 }
0x138c   :  { %v2188_v27 = vpop.xlane.xlu0 %2187 }
0x138d   :  { %3329 = vrcp.f32 %v2188_v27  ;;  %v3245_v27 = vld [vmem:[#allocation9 + $0x80] sm:$0xff]  }
0x1390   :  { %v1863_v29 = vpop.permute.xlu0 %1862 }
0x1391   :  { %1868 = vst.msk [vmem:[#allocation2] sm:$0xff] %vm655_vm7, %v1863_v29  ;;  %v3247_v29 = vld [vmem:[#allocation9 + $0x90] sm:$0xff]  }
0x1392   :  { %2078 = vst.msk [vmem:[#allocation2] sm:$0xff] %vm866_vm8, %v2073_v58 }
0x1393   :  { %v3328_v40 = vpop.eup %3327 }
0x1394   :  { %v2191_v31 = vmul.f32 %v3328_v40, %v3324_v22  ;;  %v2397_v40 = vrot.slane %v3849_v50, %v1186_v43 }
0x1396   :  { %3006 = vmatprep.mubr.msk.f32.mxu0 %vm335_vm6, %v2191_v31 }
0x1397   :  { %v3330_v32 = vpop.eup %3329 }
0x1398   :  { %v2192_v33 = vmul.f32 %v3330_v32, %v3326_v24 }
0x139a   :  { %3007 = vmatmul.mubr.msk.f32.vlgmr.msra.gmra.mrb[20].mxu0 %vm335_vm6, %v2192_v33 }
0x139b   :  { %3013 = vmatprep.mubr.msk.bf16.mxu0 %vm3493_vm1, %v3492_v18  ;;  %3010 = vmatpush3.bf16.msra.mxu0 %v3241_v37 }
0x139c   :  { %3011 = vmatprep.subr.bf16.mxu0 %v3492_v18 }
0x139f   :  { %3012 = vmatpush3.bf16.msra.mxu0 %v3242_v41 }
0x13a0   :  { %3025 = vmatprep.subr.bf16.mxu0 %v3492_v18 }
0x146d   :  { %v3008_v42 = vpop.f32.mrb[20].mxu0 }
0x146e   :  { %2284 = vrot.lane.b32.xlu1 %v3008_v42, %s3505_s16  ;;  %v2271_v44 = vpop.f32.mrb[21].mxu0 }
0x146f   :  { %2282 = vrot.lane.b32.xlu0 %v2271_v44, %s3505_s16 }
0x14e0   :  { %v2285_v49 = vpop.permute.xlu1 %2284 }
0x14e1   :  { %2289 = vst.msk [vmem:[#allocation2 + $0x8] sm:$0xff] %vm1077_vm9, %v2285_v49  ;;  %v2283_v51 = vpop.permute.xlu0 %2282 }
0x14e2   :  { %2288 = vst.msk [vmem:[#allocation2] sm:$0xff] %vm1077_vm9, %v2283_v51 }
0x14e8   :  { %v2291_v52 = vld [vmem:[#allocation2 + $0x8] sm:$0xff] }
0x14e9   :  { %v2290_v53 = vld [vmem:[#allocation2] sm:$0xff] }
0x14ea   :  { %v2292_v54 = vpack.c.bf16 %v2291_v52, %v2290_v53 }
0x14ec   :  { %3014 = vmatmul.mubr.msk.bf16.vlgmr.msra.gmra.mrb[24].mxu0 %vm102_vm0, %v2292_v54 }
0x14ed   :  { %3033 = vmatprep.mubr.msk.bf16.mxu0 %vm3493_vm1, %v3492_v18  ;;  %3026 = vmatpush3.bf16.msra.mxu0 %v3245_v27 }
0x14ee   :  { %3027 = vmatprep.subr.bf16.mxu0 %v3492_v18 }
0x14f1   :  { %3028 = vmatpush3.bf16.msra.mxu0 %v3246_v7  ;;  %v2576_v7 = vrot.slane %v3849_v50, %v1366_v28  ;;  %v2754_v28 = vld [vmem:[%s4036_s7] ss:$0 sm:$0xff] }
0x14f2   :  { %3029 = vmatprep.subr.bf16.mxu0 %v3492_v18 }
0x14f5   :  { %3030 = vmatpush3.bf16.msra.mxu0 %v3247_v29 }
0x14f6   :  { %3031 = vmatprep.subr.bf16.mxu0 %v3492_v18 }
0x14f9   :  { %3032 = vmatpush3.bf16.msra.mxu0 %v3248_v10 }
0x15bf   :  { %v2346_v39 = vpop.f32.mrb[24].mxu0 }
0x15c0   :  { %v2347_v59 = vadd.f32 %v2346_v39, %v2296_v57  ;;  %v3015_v60 = vpop.f32.mrb[25].mxu0 }
0x15c1   :  { %v2349_v62 = vpop.f32.mrb[26].mxu0 }
0x15c2   :  { %v2350_v63 = vadd.f32 %v2349_v62, %v2296_v57  ;;  %v3016_v34 = vpop.f32.mrb[27].mxu0  ;;  %v2353_v0 = vadd.f32 %v2347_v59, %v3839_v45 }
0x15c4   :  { %v2355_v35 = vsel %vm102_vm0, %v2353_v0, 0.0  ;;  %v2354_v1 = vadd.f32 %v2350_v63, %v3841_v47  ;;  %v3244_v47 = vld [vmem:[#allocation9 + $0x78] sm:$0xff]  }
0x15c5   :  { %2356 = vadd.xlane.f32.xlu0 %v2355_v35  ;;  %3020 = vmatpush3.bf16.msra.mxu1 %v3244_v47 }
0x15c6   :  { %v2358_v2 = vsel %vm102_vm0, %v2354_v1, 0.0  ;;  %3037 = vmatprep.subr.bf16.mxu1 %v3492_v18 }
0x15c7   :  { %2359 = vadd.xlane.f32.xlu1 %v2358_v2 }
0x1652   :  { %v2357_v55 = vpop.xlane.xlu0 %2356 }
0x1653   :  { %v2361_v3 = vmul.f32 0.03125, %v2357_v55 }
0x1654   :  { %v2360_v4 = vpop.xlane.xlu1 %2359 }
0x1655   :  { %v2363_v36 = vsub.f32 %v2353_v0, %v2361_v3  ;;  %v2362_v5 = vmul.f32 0.03125, %v2360_v4  ;;  %v2476_v3 = vrot.slane %v3849_v50, %v1265_v61 }
0x1657   :  { %v2364_v6 = vsub.f32 %v2354_v1, %v2362_v5  ;;  %v2365_v8 = vmul.f32 %v2363_v36, %v2363_v36 }
0x1659   :  { %v2367_v9 = vsel %vm102_vm0, %v2365_v8, 0.0  ;;  %v2366_v48 = vmul.f32 %v2364_v6, %v2364_v6 }
0x165a   :  { %2368 = vadd.xlane.f32.xlu0 %v2367_v9 }
0x165b   :  { %v2370_v45 = vsel %vm102_vm0, %v2366_v48, 0.0 }
0x165e   :  { %2371 = vadd.xlane.f32.xlu0 %v2370_v45 }
0x16e7   :  { %v2369_v11 = vpop.xlane.xlu0 %2368 }
0x16e8   :  { %v2373_v14 = vmul.f32 0.03125, %v2369_v11 }
0x16ea   :  { %v2375_v15 = vadd.f32 1e-12, %v2373_v14 }
0x16eb   :  { %v2372_v12 = vpop.xlane.xlu0 %2371 }
0x16ec   :  { %3331 = vrsqrt.f32 %v2375_v15  ;;  %v2374_v16 = vmul.f32 0.03125, %v2372_v12 }
0x16ee   :  { %v2376_v17 = vadd.f32 1e-12, %v2374_v16 }
0x16f0   :  { %3333 = vrsqrt.f32 %v2376_v17 }
0x16f6   :  { %v3332_v20 = vpop.eup %3331 }
0x16f7   :  { %v2379_v21 = vmul.f32 %v3332_v20, %v2363_v36 }
0x16f9   :  { %v2385_v58 = vmul.f32 %v2384_v46, %v2379_v21 }
0x16fa   :  { %v3334_v19 = vpop.eup %3333 }
0x16fb   :  { %v2380_v22 = vmul.f32 %v3334_v19, %v2364_v6  ;;  %v2391_v24 = vadd.f32 %v2390_v56, %v2385_v58  ;;  %v3249_v19 = vld [vmem:[#allocation11] sm:$0xff]   ;;  %v3250_v58 = vld [vmem:[#allocation11 + $0x8] sm:$0xff]  }
0x16fd   :  { %v2386_v23 = vmul.f32 %v2384_v46, %v2380_v22 }
0x16ff   :  { %v2392_v25 = vadd.f32 %v2390_v56, %v2386_v23 }
0x1701   :  { %v2393_v26 = vpack.c.bf16 %v2392_v25, %v2391_v24 }
0x1703   :  { %3022 = vmatmul.mubr.msk.bf16.vlgmr.msra.gmra.mrb[32].mxu1 %vm102_vm0, %v2393_v26 }
0x1704   :  { %3041 = vmatprep.mubr.msk.bf16.mxu1 %vm3493_vm1, %v3492_v18  ;;  %3038 = vmatpush3.bf16.msra.mxu1 %v3249_v19 }
0x1705   :  { %3039 = vmatprep.subr.bf16.mxu1 %v3492_v18  ;;  %v2582_v18 = vrot.slane %v3849_v50, %v1372_v30 }
0x1708   :  { %3040 = vmatpush3.bf16.msra.mxu1 %v3250_v58 }
0x17d6   :  { %v2447_v31 = vpop.f32.mrb[32].mxu1 }
0x17d7   :  { %v2448_v32 = vadd.f32 %v2447_v31, %v2397_v40  ;;  %v3023_v33 = vpop.f32.mrb[33].mxu1 }
0x17d8   :  { %v2450_v37 = vpop.f32.mrb[34].mxu1 }
0x17d9   :  { %v2454_v41 = vmul.f32 %v2448_v32, %v2448_v32  ;;  %v2451_v42 = vadd.f32 %v2450_v37, %v2397_v40  ;;  %v3024_v44 = vpop.f32.mrb[35].mxu1 }
0x17db   :  { %v2456_v49 = vmul.f32 %v2454_v41, %v2448_v32  ;;  %v2455_v51 = vmul.f32 %v2451_v42, %v2451_v42 }
0x17dd   :  { %v2458_v52 = vmul.f32 0.044715, %v2456_v49  ;;  %v2457_v53 = vmul.f32 %v2455_v51, %v2451_v42 }
0x17df   :  { %v2460_v54 = vadd.f32 %v2458_v52, %v2448_v32  ;;  %v2459_v57 = vmul.f32 0.044715, %v2457_v53 }
0x17e1   :  { %v2462_v39 = vmul.f32 0.7978846, %v2460_v54  ;;  %v2461_v59 = vadd.f32 %v2459_v57, %v2451_v42 }
0x17e3   :  { %3335 = vtanh.f32 %v2462_v39  ;;  %v2463_v60 = vmul.f32 0.7978846, %v2461_v59 }
0x17e5   :  { %3337 = vtanh.f32 %v2463_v60 }
0x17ed   :  { %v3336_v62 = vpop.eup %3335 }
0x17ee   :  { %v2466_v43 = vadd.f32 1.0, %v3336_v62 }
0x17ef   :  { %v3338_v63 = vpop.eup %3337 }
0x17f0   :  { %v2468_v34 = vmul.f32 0.5, %v2466_v43  ;;  %v2467_v0 = vadd.f32 1.0, %v3338_v63 }
0x17f2   :  { %v2469_v35 = vmul.f32 0.5, %v2467_v0  ;;  %v2470_v1 = vmul.f32 %v2468_v34, %v2448_v32 }
0x17f4   :  { %v2471_v2 = vmul.f32 %v2469_v35, %v2451_v42 }
0x17f6   :  { %v2472_v55 = vpack.c.bf16 %v2471_v2, %v2470_v1 }
0x17f8   :  { %3034 = vmatmul.mubr.msk.bf16.vlgmr.msra.gmra.mrb[28].mxu0 %vm1291_vm10, %v2472_v55 }
0x18cb   :  { %v2538_v4 = vpop.f32.mrb[28].mxu0 }
0x18cc   :  { %v2539_v36 = vadd.f32 %v2538_v4, %v2476_v3  ;;  %v3035_v5 = vpop.f32.mrb[29].mxu0 }
0x18cd   :  { %v2541_v6 = vpop.f32.mrb[30].mxu0 }
0x18ce   :  { %v2542_v8 = vadd.f32 %v2541_v6, %v2476_v3  ;;  %v3036_v9 = vpop.f32.mrb[31].mxu0  ;;  %v2545_v48 = vadd.f32 %v2539_v36, %v2391_v24 }
0x18d0   :  { %v2547_v45 = vsel %vm102_vm0, %v2545_v48, 0.0  ;;  %v2546_v13 = vadd.f32 %v2542_v8, %v2392_v25 }
0x18d1   :  { %2548 = vadd.xlane.f32.xlu1 %v2547_v45 }
0x18d2   :  { %v2550_v47 = vsel %vm102_vm0, %v2546_v13, 0.0 }
0x18d3   :  { %2551 = vadd.xlane.f32.xlu0 %v2550_v47 }
0x195e   :  { %v2549_v11 = vpop.xlane.xlu1 %2548 }
0x195f   :  { %v2553_v14 = vmul.f32 0.03125, %v2549_v11 }
0x1960   :  { %v2552_v15 = vpop.xlane.xlu0 %2551 }
0x1961   :  { %v2555_v12 = vsub.f32 %v2545_v48, %v2553_v14  ;;  %v2554_v16 = vmul.f32 0.03125, %v2552_v15 }
0x1963   :  { %v2556_v61 = vsub.f32 %v2546_v13, %v2554_v16  ;;  %v2557_v17 = vmul.f32 %v2555_v12, %v2555_v12 }
0x1965   :  { %v2559_v20 = vsel %vm102_vm0, %v2557_v17, 0.0  ;;  %v2558_v46 = vmul.f32 %v2556_v61, %v2556_v61 }
0x1966   :  { %2560 = vadd.xlane.f32.xlu1 %v2559_v20 }
0x1967   :  { %v2562_v21 = vsel %vm102_vm0, %v2558_v46, 0.0 }
0x1968   :  { %2563 = vadd.xlane.f32.xlu0 %v2562_v21 }
0x19f3   :  { %v2561_v22 = vpop.xlane.xlu1 %2560 }
0x19f4   :  { %v2565_v56 = vmul.f32 0.03125, %v2561_v22 }
0x19f5   :  { %v2564_v23 = vpop.xlane.xlu0 %2563 }
0x19f6   :  { %v2567_v24 = vadd.f32 1e-12, %v2565_v56  ;;  %v2566_v25 = vmul.f32 0.03125, %v2564_v23 }
0x19f8   :  { %3339 = vrsqrt.f32 %v2567_v24  ;;  %v2568_v26 = vadd.f32 1e-12, %v2566_v25 }
0x19fa   :  { %3341 = vrsqrt.f32 %v2568_v26 }
0x1a02   :  { %v3340_v27 = vpop.eup %3339 }
0x1a03   :  { %v2571_v29 = vmul.f32 %v3340_v27, %v2555_v12 }
0x1a04   :  { %v3342_v10 = vpop.eup %3341 }
0x1a05   :  { %v2572_v40 = vmul.f32 %v3342_v10, %v2556_v61  ;;  %v2577_v31 = vmul.f32 %v2576_v7, %v2571_v29 }
0x1a07   :  { %v2578_v32 = vmul.f32 %v2576_v7, %v2572_v40  ;;  %v2583_v37 = vadd.f32 %v2582_v18, %v2577_v31 }
0x1a09   :  { %v2584_v33 = vadd.f32 %v2582_v18, %v2578_v32 }
0x1a0b   :  { %v2586_v41 = vrot.slane %v2584_v33, 7 }
0x1a0d   :  { %v2589_v42 = vsel %vm2588_vm11, %v2583_v37, %v2586_v41 }
0x1a0e   :  { %v2590_v44 = vpack.c.bf16 %v2589_v42, %v2589_v42 }
0x1a10   :  { %3042 = vmatmul.mubr.msk.bf16.vlgmr.msra.gmra.mrb[36].mxu1 %vm102_vm0, %v2590_v44 }
0x1ae3   :  { %v2651_v49 = vpop.f32.mrb[36].mxu1 }
0x1ae4   :  { %v2652_v38 = vadd.f32 %v2754_v28, %v2651_v49  ;;  %v3043_v51 = vpop.f32.mrb[37].mxu1 }
0x1ae5   :  { %v2654_v30 = vpop.f32.mrb[38].mxu1 }
0x1ae6   :  { %2657 = vst [vmem:[#allocation12] sm:$0x3] %v2652_v38  ;;  %v3044_v50 = vpop.f32.mrb[39].mxu1 }
0x1ae7   :  { %3464 = shalt.err (!%p3461_p2)
}
0x1ae8   :  { %s3465_s7 = scalar_lea.hbm %s4037_s8, 32 }
0x1ae9   :  { %p3466_p3 = scmp.ne.s32.totalorder %s4037_s8, %s3465_s7  ;;  %p3469_p4 = scmp.lt.u32.totalorder %s3465_s7, %s4037_s8 }
0x1aeb   :  { %p3471_p5 = pnand %p3469_p4, %p3466_p3 }
0x1aed   :  { %3474 = shalt.err (!%p3471_p5)
}
0x1aee   :  { %2667 = dma.vmem_to_hbm [thread:$0]  %s2665_s4, 32, %s4037_s8, [#allocation5]  }
0x1aef   :  { %3481 = dma.done.wait [#allocation5], 32  }
0x1af0   :  { %3482 = vsyncadd [#allocation5], 4294967264 }
0x1af1   :  { %2671 = vsyncpa [#allocation4], 1 }
0x1af2   :  { %2672 = vsyncpa [#allocation7], 1 }
0x1af3   :  { %2673 = vsyncpa [#allocation10], 1 }
0x1af4   :  { %2674 = vsyncpa [#allocation5], 1 }

</bundles_post_ra>
